<compile_context>
chip_gen: v7x
topology: tpu7x:2x2x1
jax: 0.10.0
libtpu: 0.0.40
codegen_flags: <defaults>
</compile_context>

<pallas_src>
import functools

import jax
import jax.numpy as jnp
import numpy as np
from jax.experimental import pallas as pl
from jax.experimental.pallas import tpu as pltpu

NUM_CLASSES = 3          # kwargs['num_classes']
REG_CH = 50              # MonoFlex regression channel total (see breakdown above)
HIDDEN = 32              # kwargs['num_channel'] scaled down for the demo (256 -> 32)
REG_ROW0 = 8             # reg rows start at a sublane-aligned row of the fused head
HEAD_PAD = 64            # fused 1x1 head rows: 3 cls + 5 zero + 50 reg + 6 zero
TILE_H = 8               # spatial row block (TILE_H * W lands on the output lane axis)


def head_kernel(xc_ref, xt_ref, xb_ref,
                w3_ref, b3_ref, w1_ref, b1_ref,
                hm_ref, reg_ref,
                xpad_ref, patch_ref):
    """One (batch, row-block) tile per grid step.

    xc_ref   : (1, T, W, Cin)      bf16 row block of the feature map
    xt_ref   : (1, 1, W, Cin)      bf16 top halo row (row r*T - 1, clamped at the edge)
    xb_ref   : (1, 1, W, Cin)      bf16 bottom halo row (row (r+1)*T, clamped)
    w3_ref   : (9*Cin, 2*Chid)     bf16 fused cls+reg 3x3 conv weight (tap-major rows)
    b3_ref   : (1, 2*Chid)         f32 fused conv bias
    w1_ref   : (2*Chid, HEAD_PAD)  bf16 block-diagonal fused 1x1 heads
    b1_ref   : (1, HEAD_PAD)       f32
    hm_ref   : (1, NUM_CLASSES, T*W) f32 output (lane-dense: spatial on lanes)
    reg_ref  : (1, REG_CH, T*W)      f32 output
    xpad_ref : (T+2, W+2, Cin)     f32 zero-bordered scratch (in-kernel padding;
                                   kept f32 so the sublane-offset slices stay on
                                   the known-good 32-bit path -- it is ~1/9 the
                                   size of the bf16 patch scratch)
    patch_ref: (T*W, 9*Cin)        bf16 im2col scratch
    """
    r = pl.program_id(1)
    n_r = pl.num_programs(1)
    T, W, Cin = xc_ref.shape[1], xc_ref.shape[2], xc_ref.shape[3]
    TW = T * W

    # ---- in-kernel zero padding (replaces the wrapper-side jnp.pad) ----------
    zcol = jnp.zeros((T + 2, 1, Cin), jnp.float32)
    xpad_ref[:, 0:1, :] = zcol                      # left border
    xpad_ref[:, W + 1:W + 2, :] = zcol              # right border
    top_gate = (r > 0).astype(jnp.float32)          # image top edge -> zeros
    bot_gate = (r < n_r - 1).astype(jnp.float32)    # image bottom edge -> zeros
    xpad_ref[0:1, 1:W + 1, :] = xt_ref[0].astype(jnp.float32) * top_gate
    xpad_ref[T + 1:T + 2, 1:W + 1, :] = xb_ref[0].astype(jnp.float32) * bot_gate
    xpad_ref[1:T + 1, 1:W + 1, :] = xc_ref[0].astype(jnp.float32)

    # ---- im2col: 9 statically shifted taps along the contraction axis --------
    # TODO(synk): for production Cin >= 128 switch to 9 accumulated matmuls over
    #             shifted views (K = Cin already fills the MXU depth) and drop
    #             this scratch + its store traffic entirely.
    for dy in range(3):
        for dx in range(3):
            t = dy * 3 + dx
            patch_ref[:, t * Cin:(t + 1) * Cin] = (
                xpad_ref[dy:dy + T, dx:dx + W, :]
                .reshape(TW, Cin).astype(jnp.bfloat16))

    # ---- fused cls+reg 3x3 conv: ONE deep bf16 matmul, f32 accumulation ------
    conv = jnp.dot(patch_ref[...], w3_ref[...],
                   preferred_element_type=jnp.float32)              # (TW, 2*Chid)
    feat = jnp.maximum(conv + b3_ref[...], 0.0).astype(jnp.bfloat16)

    # ---- ONE fused 1x1 head matmul (block-diagonal weight).  feat streams as
    # the (M, K) operand un-transposed; only the small (TW, 64) result is
    # transposed for lane-dense stores. ----------------------------------------
    heads = jnp.dot(feat, w1_ref[...],
                    preferred_element_type=jnp.float32) + b1_ref[...]   # (TW, 64)
    heads_t = heads.T                                                   # (64, TW)

    hm = jnp.clip(jax.nn.sigmoid(heads_t[0:NUM_CLASSES, :]), 1e-4, 1.0 - 1e-4)
    hm_ref[...] = hm.reshape(hm_ref.shape)
    reg_ref[...] = heads_t[REG_ROW0:REG_ROW0 + REG_CH, :].reshape(reg_ref.shape)


def monoflex_center_head_forward(x_nchw, params, tile_h=TILE_H):
    """x_nchw: (B, Cin, H, W) float32 feature map (e.g. DLA backbone output).

    Returns (heatmap, regression) in NCHW like the PyTorch predictor.
    """
    B, Cin, H, W = x_nchw.shape
    tile_h = min(tile_h, H)
    assert H % tile_h == 0, "tile_h must divide the feature-map height"
    n_r = H // tile_h
    HW = H * W
    Chid = params["w3_cls"].shape[2]
    C2 = 2 * Chid

    # NCHW -> NHWC + bf16 transport in one XLA copy pass (the MXU only ever sees
    # bf16 operands).  TODO(synk): have the backbone emit NHWC bf16 directly so
    # even this copy disappears.
    x = jnp.transpose(x_nchw, (0, 2, 3, 1)).astype(jnp.bfloat16)

    # Fused 3x3 conv weight (im2col tap-major rows) and block-diagonal fused 1x1
    # heads so each head reads only its half of feat.
    # NOTE: a real PyTorch checkpoint stores conv weights as (Cout, Cin, kh, kw);
    # permute to (kh*kw, Cin, Cout) before building these.
    w3_comb = jnp.concatenate(
        [params["w3_cls"].reshape(9 * Cin, Chid),
         params["w3_reg"].reshape(9 * Cin, Chid)], axis=1).astype(jnp.bfloat16)
    b3_comb = jnp.concatenate([params["b3_cls"], params["b3_reg"]], axis=1)  # (1, 2*Chid) f32

    w1_comb = jnp.zeros((C2, HEAD_PAD), jnp.float32)
    w1_comb = w1_comb.at[:Chid, 0:NUM_CLASSES].set(params["w1_cls"])
    w1_comb = w1_comb.at[Chid:, REG_ROW0:REG_ROW0 + REG_CH].set(params["w1_reg"])
    w1_comb = w1_comb.astype(jnp.bfloat16)
    b1_comb = jnp.zeros((1, HEAD_PAD), jnp.float32)
    b1_comb = b1_comb.at[0, 0:NUM_CLASSES].set(params["b1_cls"][0])
    b1_comb = b1_comb.at[0, REG_ROW0:REG_ROW0 + REG_CH].set(params["b1_reg"][0])

    flops = 2 * B * HW * (9 * Cin) * C2 + 2 * B * HW * C2 * HEAD_PAD
    bytes_accessed = (x.size * 2
                      + (w3_comb.size + w1_comb.size) * 2
                      + (b3_comb.size + b1_comb.size) * 4
                      + B * HW * (NUM_CLASSES + REG_CH) * 4)
    cost = pl.CostEstimate(flops=int(flops),
                           transcendentals=int(B * HW * NUM_CLASSES),
                           bytes_accessed=int(bytes_accessed))

    grid_spec = pltpu.PrefetchScalarGridSpec(
        num_scalar_prefetch=0,
        grid=(B, n_r),
        in_specs=[
            # row block + two 1-row halos (clamped at the image edges; the kernel
            # zero-gates them there), all streamed as bf16.
            pl.BlockSpec((1, tile_h, W, Cin), lambda b, r: (b, r, 0, 0)),
            pl.BlockSpec((1, 1, W, Cin),
                         lambda b, r: (b, jnp.maximum(r * tile_h - 1, 0), 0, 0)),
            pl.BlockSpec((1, 1, W, Cin),
                         lambda b, r: (b, jnp.minimum((r + 1) * tile_h, H - 1), 0, 0)),
            # constant-index weights/biases: fetched once, stay resident in VMEM.
            # TODO(synk): pipeline_mode=pl.Buffered(1) to drop their 2nd buffer on v7x.
            pl.BlockSpec((9 * Cin, C2), lambda b, r: (0, 0)),
            pl.BlockSpec((1, C2), lambda b, r: (0, 0)),
            pl.BlockSpec((C2, HEAD_PAD), lambda b, r: (0, 0)),
            pl.BlockSpec((1, HEAD_PAD), lambda b, r: (0, 0)),
        ],
        out_specs=[
            pl.BlockSpec((1, NUM_CLASSES, tile_h * W), lambda b, r: (b, 0, r)),
            pl.BlockSpec((1, REG_CH, tile_h * W), lambda b, r: (b, 0, r)),
        ],
        scratch_shapes=[
            pltpu.VMEM((tile_h + 2, W + 2, Cin), jnp.float32),     # padded row block
            pltpu.VMEM((tile_h * W, 9 * Cin), jnp.bfloat16),       # im2col patch
        ],
    )

    hm_flat, reg_flat = pl.pallas_call(
        head_kernel,
        out_shape=(
            jax.ShapeDtypeStruct((B, NUM_CLASSES, HW), jnp.float32),
            jax.ShapeDtypeStruct((B, REG_CH, HW), jnp.float32),
        ),
        grid_spec=grid_spec,
        compiler_params=pltpu.CompilerParams(
            dimension_semantics=("parallel", "parallel")),
        # TODO(synk): at production shapes (Cin~256, HW~30k) raise vmem_limit_bytes
        #             and retune tile_h per chip (v5e scoped default 16 MiB,
        #             v7x physical 64 MiB).
        cost_estimate=cost,
    )(x, x, x, w3_comb, b3_comb, w1_comb, b1_comb)

    # (B, C, H*W) -> (B, C, H, W) is a free reshape (no output transpose pass).
    return (hm_flat.reshape(B, NUM_CLASSES, H, W),
            reg_flat.reshape(B, REG_CH, H, W))


def init_params(key, cin, chid):
    ks = jax.random.split(key, 6)
    scale3 = 1.0 / np.sqrt(9 * cin)
    scale1 = 1.0 / np.sqrt(chid)
    init_p = 0.01  # kwargs['init_p'] -> focal-style bias init for the heatmap head
    params = {
        "w3_cls": jax.random.normal(ks[0], (9, cin, chid), jnp.float32) * scale3,
        "b3_cls": jnp.zeros((1, chid), jnp.float32),
        "w1_cls": jax.random.normal(ks[1], (chid, NUM_CLASSES), jnp.float32) * scale1,
        "b1_cls": jnp.full((1, NUM_CLASSES), -float(np.log((1 - init_p) / init_p)),
                           jnp.float32),
        "w3_reg": jax.random.normal(ks[2], (9, cin, chid), jnp.float32) * scale3,
        "b3_reg": jnp.zeros((1, chid), jnp.float32),
        "w1_reg": jax.random.normal(ks[3], (chid, REG_CH), jnp.float32) * scale1,
        "b1_reg": jnp.zeros((1, REG_CH), jnp.float32),
    }
    return params


def reference_forward(x_nchw, params):
    """Pure-JAX reference (lax conv) matching the kernel's bf16 quantization points."""
    def q(a):  # round to bf16 like the kernel's MXU operands, compute in f32
        return a.astype(jnp.bfloat16).astype(jnp.float32)

    x = jnp.transpose(q(x_nchw), (0, 2, 3, 1))  # NHWC
    cin = x.shape[-1]

    def branch(w3, b3, w1, b1):
        w3_hwio = q(w3).reshape(3, 3, cin, -1)
        feat = jax.lax.conv_general_dilated(
            x, w3_hwio, window_strides=(1, 1), padding="SAME",
            dimension_numbers=("NHWC", "HWIO", "NHWC"))
        feat = jnp.maximum(feat + b3.reshape(1, 1, 1, -1), 0.0)
        out = jnp.einsum("bhwc,cd->bhwd", q(feat), q(w1)) + b1.reshape(1, 1, 1, -1)
        return out

    hm = branch(params["w3_cls"], params["b3_cls"],
                params["w1_cls"], params["b1_cls"])
    hm = jnp.clip(jax.nn.sigmoid(hm), 1e-4, 1.0 - 1e-4)
    reg = branch(params["w3_reg"], params["b3_reg"],
                 params["w1_reg"], params["b1_reg"])
    return (jnp.transpose(hm, (0, 3, 1, 2)),
            jnp.transpose(reg, (0, 3, 1, 2)))


if __name__ == "__main__":
    key = jax.random.PRNGKey(0)
    k_x, k_p = jax.random.split(key)

    B, Cin, H, W = 2, 4, 16, 16   # small synthetic feature map (NCHW, PyTorch conv convention)
    x = jax.random.normal(k_x, (B, Cin, H, W), jnp.float32)
    params = init_params(k_p, Cin, HIDDEN)

    fwd = jax.jit(functools.partial(monoflex_center_head_forward, params=params))
    hm, reg = fwd(x)
    jax.block_until_ready(hm)
    jax.block_until_ready(reg)

    hm_ref, reg_ref = reference_forward(x, params)
    assert hm.shape == (B, NUM_CLASSES, H, W)
    assert reg.shape == (B, REG_CH, H, W)
    # bf16 matmul operands -> relaxed tolerance vs the f32 original.
    np.testing.assert_allclose(np.asarray(hm), np.asarray(hm_ref), rtol=1e-2, atol=1e-2)
    np.testing.assert_allclose(np.asarray(reg), np.asarray(reg_ref), rtol=1e-2, atol=1e-2)

    print("KERNEL_OK")
</pallas_src>

<mosaic_0001>
module attributes {stable_mosaic.version = 11 : i64} {
  func.func @head_kernel(%arg0: i32, %arg1: i32, %arg2: memref<1x8x16x4xbf16, #tpu.memory_space<vmem>>, %arg3: memref<1x1x16x4xbf16, #tpu.memory_space<vmem>>, %arg4: memref<1x1x16x4xbf16, #tpu.memory_space<vmem>>, %arg5: memref<36x64xbf16, #tpu.memory_space<vmem>>, %arg6: memref<1x64xf32, #tpu.memory_space<vmem>>, %arg7: memref<64x64xbf16, #tpu.memory_space<vmem>>, %arg8: memref<1x64xf32, #tpu.memory_space<vmem>>, %arg9: memref<1x3x128xf32, #tpu.memory_space<vmem>>, %arg10: memref<1x50x128xf32, #tpu.memory_space<vmem>>, %arg11: memref<10x18x4xf32, #tpu.memory_space<vmem>>, %arg12: memref<128x36xbf16, #tpu.memory_space<vmem>>) attributes {dimension_semantics = [#tpu.dimension_semantics<parallel>, #tpu.dimension_semantics<parallel>], iteration_bounds = array<i64: 2, 2>, scalar_prefetch = 0 : i64, scratch_operands = 2 : i64, tpu.core_type = #tpu.core_type<tc>, window_params = [{transform_indices = @transform_0, window_bounds = array<i64: 1, 8, 16, 4>}, {transform_indices = @transform_1, window_bounds = array<i64: 1, 1, 16, 4>}, {transform_indices = @transform_2, window_bounds = array<i64: 1, 1, 16, 4>}, {pipeline_mode = #tpu.pipeline_mode<synchronous>, transform_indices = @transform_3, window_bounds = array<i64: 36, 64>}, {pipeline_mode = #tpu.pipeline_mode<synchronous>, transform_indices = @transform_4, window_bounds = array<i64: 1, 64>}, {pipeline_mode = #tpu.pipeline_mode<synchronous>, transform_indices = @transform_5, window_bounds = array<i64: 64, 64>}, {pipeline_mode = #tpu.pipeline_mode<synchronous>, transform_indices = @transform_6, window_bounds = array<i64: 1, 64>}, {transform_indices = @transform_7, window_bounds = array<i64: 1, 3, 128>}, {transform_indices = @transform_8, window_bounds = array<i64: 1, 50, 128>}]} {
    %cst = arith.constant 0.000000e+00 : f32
    %0 = vector.broadcast %cst : f32 to vector<10x1x4xf32>
    %c0 = arith.constant 0 : index
    %c0_0 = arith.constant 0 : index
    %c0_1 = arith.constant 0 : index
    %1 = vector.load %arg11[%c0, %c0_0, %c0_1] : memref<10x18x4xf32, #tpu.memory_space<vmem>>, vector<10x1x4xf32>
    tpu.vector_store %arg11[%c0, %c0_0, %c0_1], %0 {strides = array<i32>} : memref<10x18x4xf32, #tpu.memory_space<vmem>>, vector<10x1x4xf32>,
    %c0_2 = arith.constant 0 : index
    %c17 = arith.constant 17 : index
    %c0_3 = arith.constant 0 : index
    %2 = vector.load %arg11[%c0_2, %c17, %c0_3] : memref<10x18x4xf32, #tpu.memory_space<vmem>>, vector<10x1x4xf32>
    tpu.vector_store %arg11[%c0_2, %c17, %c0_3], %0 {strides = array<i32>} : memref<10x18x4xf32, #tpu.memory_space<vmem>>, vector<10x1x4xf32>,
    %c0_i32 = arith.constant 0 : i32
    %3 = arith.cmpi sgt, %arg1, %c0_i32 : i32
    %4 = arith.extui %3 : i1 to i32
    %5 = arith.sitofp %4 : i32 to f32
    %c1_i32 = arith.constant 1 : i32
    %6 = arith.cmpi slt, %arg1, %c1_i32 : i32
    %7 = arith.extui %6 : i1 to i32
    %8 = arith.sitofp %7 : i32 to f32
    %c0_4 = arith.constant 0 : index
    %c0_5 = arith.constant 0 : index
    %c0_6 = arith.constant 0 : index
    %c0_7 = arith.constant 0 : index
    %9 = vector.load %arg3[%c0_4, %c0_5, %c0_6, %c0_7] : memref<1x1x16x4xbf16, #tpu.memory_space<vmem>>, vector<1x1x16x4xbf16>
    %10 = vector.shape_cast %9 : vector<1x1x16x4xbf16> to vector<1x16x4xbf16>
    %11 = arith.extf %10 : vector<1x16x4xbf16> to vector<1x16x4xf32>
    %12 = vector.broadcast %5 : f32 to vector<1x16x4xf32>
    %13 = arith.mulf %11, %12 : vector<1x16x4xf32>
    %c0_8 = arith.constant 0 : index
    %c1 = arith.constant 1 : index
    %c0_9 = arith.constant 0 : index
    %14 = vector.load %arg11[%c0_8, %c1, %c0_9] : memref<10x18x4xf32, #tpu.memory_space<vmem>>, vector<1x16x4xf32>
    tpu.vector_store %arg11[%c0_8, %c1, %c0_9], %13 {strides = array<i32>} : memref<10x18x4xf32, #tpu.memory_space<vmem>>, vector<1x16x4xf32>,
    %c0_10 = arith.constant 0 : index
    %c0_11 = arith.constant 0 : index
    %c0_12 = arith.constant 0 : index
    %c0_13 = arith.constant 0 : index
    %15 = vector.load %arg4[%c0_10, %c0_11, %c0_12, %c0_13] : memref<1x1x16x4xbf16, #tpu.memory_space<vmem>>, vector<1x1x16x4xbf16>
    %16 = vector.shape_cast %15 : vector<1x1x16x4xbf16> to vector<1x16x4xbf16>
    %17 = arith.extf %16 : vector<1x16x4xbf16> to vector<1x16x4xf32>
    %18 = vector.broadcast %8 : f32 to vector<1x16x4xf32>
    %19 = arith.mulf %17, %18 : vector<1x16x4xf32>
    %c9 = arith.constant 9 : index
    %c1_14 = arith.constant 1 : index
    %c0_15 = arith.constant 0 : index
    %20 = vector.load %arg11[%c9, %c1_14, %c0_15] : memref<10x18x4xf32, #tpu.memory_space<vmem>>, vector<1x16x4xf32>
    tpu.vector_store %arg11[%c9, %c1_14, %c0_15], %19 {strides = array<i32>} : memref<10x18x4xf32, #tpu.memory_space<vmem>>, vector<1x16x4xf32>,
    %c0_16 = arith.constant 0 : index
    %c0_17 = arith.constant 0 : index
    %c0_18 = arith.constant 0 : index
    %c0_19 = arith.constant 0 : index
    %21 = vector.load %arg2[%c0_16, %c0_17, %c0_18, %c0_19] : memref<1x8x16x4xbf16, #tpu.memory_space<vmem>>, vector<1x8x16x4xbf16>
    %22 = vector.shape_cast %21 : vector<1x8x16x4xbf16> to vector<8x16x4xbf16>
    %23 = arith.extf %22 : vector<8x16x4xbf16> to vector<8x16x4xf32>
    %c1_20 = arith.constant 1 : index
    %c1_21 = arith.constant 1 : index
    %c0_22 = arith.constant 0 : index
    %24 = vector.load %arg11[%c1_20, %c1_21, %c0_22] : memref<10x18x4xf32, #tpu.memory_space<vmem>>, vector<8x16x4xf32>
    tpu.vector_store %arg11[%c1_20, %c1_21, %c0_22], %23 {strides = array<i32>} : memref<10x18x4xf32, #tpu.memory_space<vmem>>, vector<8x16x4xf32>,
    %c0_23 = arith.constant 0 : index
    %c0_24 = arith.constant 0 : index
    %c0_25 = arith.constant 0 : index
    %25 = vector.load %arg11[%c0_23, %c0_24, %c0_25] : memref<10x18x4xf32, #tpu.memory_space<vmem>>, vector<8x16x4xf32>
    %26 = vector.shape_cast %25 : vector<8x16x4xf32> to vector<128x4xf32>
    %27 = arith.truncf %26 : vector<128x4xf32> to vector<128x4xbf16>
    %c0_26 = arith.constant 0 : index
    %c0_27 = arith.constant 0 : index
    %28 = vector.load %arg12[%c0_26, %c0_27] : memref<128x36xbf16, #tpu.memory_space<vmem>>, vector<128x4xbf16>
    tpu.vector_store %arg12[%c0_26, %c0_27], %27 {strides = array<i32>} : memref<128x36xbf16, #tpu.memory_space<vmem>>, vector<128x4xbf16>,
    %c0_28 = arith.constant 0 : index
    %c1_29 = arith.constant 1 : index
    %c0_30 = arith.constant 0 : index
    %29 = vector.load %arg11[%c0_28, %c1_29, %c0_30] : memref<10x18x4xf32, #tpu.memory_space<vmem>>, vector<8x16x4xf32>
    %30 = vector.shape_cast %29 : vector<8x16x4xf32> to vector<128x4xf32>
    %31 = arith.truncf %30 : vector<128x4xf32> to vector<128x4xbf16>
    %c0_31 = arith.constant 0 : index
    %c4 = arith.constant 4 : index
    %32 = vector.load %arg12[%c0_31, %c4] : memref<128x36xbf16, #tpu.memory_space<vmem>>, vector<128x4xbf16>
    tpu.vector_store %arg12[%c0_31, %c4], %31 {strides = array<i32>} : memref<128x36xbf16, #tpu.memory_space<vmem>>, vector<128x4xbf16>,
    %c0_32 = arith.constant 0 : index
    %c2 = arith.constant 2 : index
    %c0_33 = arith.constant 0 : index
    %33 = vector.load %arg11[%c0_32, %c2, %c0_33] : memref<10x18x4xf32, #tpu.memory_space<vmem>>, vector<8x16x4xf32>
    %34 = vector.shape_cast %33 : vector<8x16x4xf32> to vector<128x4xf32>
    %35 = arith.truncf %34 : vector<128x4xf32> to vector<128x4xbf16>
    %c0_34 = arith.constant 0 : index
    %c8 = arith.constant 8 : index
    %36 = vector.load %arg12[%c0_34, %c8] : memref<128x36xbf16, #tpu.memory_space<vmem>>, vector<128x4xbf16>
    tpu.vector_store %arg12[%c0_34, %c8], %35 {strides = array<i32>} : memref<128x36xbf16, #tpu.memory_space<vmem>>, vector<128x4xbf16>,
    %c1_35 = arith.constant 1 : index
    %c0_36 = arith.constant 0 : index
    %c0_37 = arith.constant 0 : index
    %37 = vector.load %arg11[%c1_35, %c0_36, %c0_37] : memref<10x18x4xf32, #tpu.memory_space<vmem>>, vector<8x16x4xf32>
    %38 = vector.shape_cast %37 : vector<8x16x4xf32> to vector<128x4xf32>
    %39 = arith.truncf %38 : vector<128x4xf32> to vector<128x4xbf16>
    %c0_38 = arith.constant 0 : index
    %c12 = arith.constant 12 : index
    %40 = vector.load %arg12[%c0_38, %c12] : memref<128x36xbf16, #tpu.memory_space<vmem>>, vector<128x4xbf16>
    tpu.vector_store %arg12[%c0_38, %c12], %39 {strides = array<i32>} : memref<128x36xbf16, #tpu.memory_space<vmem>>, vector<128x4xbf16>,
    %c1_39 = arith.constant 1 : index
    %c1_40 = arith.constant 1 : index
    %c0_41 = arith.constant 0 : index
    %41 = vector.load %arg11[%c1_39, %c1_40, %c0_41] : memref<10x18x4xf32, #tpu.memory_space<vmem>>, vector<8x16x4xf32>
    %42 = vector.shape_cast %41 : vector<8x16x4xf32> to vector<128x4xf32>
    %43 = arith.truncf %42 : vector<128x4xf32> to vector<128x4xbf16>
    %c0_42 = arith.constant 0 : index
    %c16 = arith.constant 16 : index
    %44 = vector.load %arg12[%c0_42, %c16] : memref<128x36xbf16, #tpu.memory_space<vmem>>, vector<128x4xbf16>
    tpu.vector_store %arg12[%c0_42, %c16], %43 {strides = array<i32>} : memref<128x36xbf16, #tpu.memory_space<vmem>>, vector<128x4xbf16>,
    %c1_43 = arith.constant 1 : index
    %c2_44 = arith.constant 2 : index
    %c0_45 = arith.constant 0 : index
    %45 = vector.load %arg11[%c1_43, %c2_44, %c0_45] : memref<10x18x4xf32, #tpu.memory_space<vmem>>, vector<8x16x4xf32>
    %46 = vector.shape_cast %45 : vector<8x16x4xf32> to vector<128x4xf32>
    %47 = arith.truncf %46 : vector<128x4xf32> to vector<128x4xbf16>
    %c0_46 = arith.constant 0 : index
    %c20 = arith.constant 20 : index
    %48 = vector.load %arg12[%c0_46, %c20] : memref<128x36xbf16, #tpu.memory_space<vmem>>, vector<128x4xbf16>
    tpu.vector_store %arg12[%c0_46, %c20], %47 {strides = array<i32>} : memref<128x36xbf16, #tpu.memory_space<vmem>>, vector<128x4xbf16>,
    %c2_47 = arith.constant 2 : index
    %c0_48 = arith.constant 0 : index
    %c0_49 = arith.constant 0 : index
    %49 = vector.load %arg11[%c2_47, %c0_48, %c0_49] : memref<10x18x4xf32, #tpu.memory_space<vmem>>, vector<8x16x4xf32>
    %50 = vector.shape_cast %49 : vector<8x16x4xf32> to vector<128x4xf32>
    %51 = arith.truncf %50 : vector<128x4xf32> to vector<128x4xbf16>
    %c0_50 = arith.constant 0 : index
    %c24 = arith.constant 24 : index
    %52 = vector.load %arg12[%c0_50, %c24] : memref<128x36xbf16, #tpu.memory_space<vmem>>, vector<128x4xbf16>
    tpu.vector_store %arg12[%c0_50, %c24], %51 {strides = array<i32>} : memref<128x36xbf16, #tpu.memory_space<vmem>>, vector<128x4xbf16>,
    %c2_51 = arith.constant 2 : index
    %c1_52 = arith.constant 1 : index
    %c0_53 = arith.constant 0 : index
    %53 = vector.load %arg11[%c2_51, %c1_52, %c0_53] : memref<10x18x4xf32, #tpu.memory_space<vmem>>, vector<8x16x4xf32>
    %54 = vector.shape_cast %53 : vector<8x16x4xf32> to vector<128x4xf32>
    %55 = arith.truncf %54 : vector<128x4xf32> to vector<128x4xbf16>
    %c0_54 = arith.constant 0 : index
    %c28 = arith.constant 28 : index
    %56 = vector.load %arg12[%c0_54, %c28] : memref<128x36xbf16, #tpu.memory_space<vmem>>, vector<128x4xbf16>
    tpu.vector_store %arg12[%c0_54, %c28], %55 {strides = array<i32>} : memref<128x36xbf16, #tpu.memory_space<vmem>>, vector<128x4xbf16>,
    %c2_55 = arith.constant 2 : index
    %c2_56 = arith.constant 2 : index
    %c0_57 = arith.constant 0 : index
    %57 = vector.load %arg11[%c2_55, %c2_56, %c0_57] : memref<10x18x4xf32, #tpu.memory_space<vmem>>, vector<8x16x4xf32>
    %58 = vector.shape_cast %57 : vector<8x16x4xf32> to vector<128x4xf32>
    %59 = arith.truncf %58 : vector<128x4xf32> to vector<128x4xbf16>
    %c0_58 = arith.constant 0 : index
    %c32 = arith.constant 32 : index
    %60 = vector.load %arg12[%c0_58, %c32] : memref<128x36xbf16, #tpu.memory_space<vmem>>, vector<128x4xbf16>
    tpu.vector_store %arg12[%c0_58, %c32], %59 {strides = array<i32>} : memref<128x36xbf16, #tpu.memory_space<vmem>>, vector<128x4xbf16>,
    %c0_59 = arith.constant 0 : index
    %c0_60 = arith.constant 0 : index
    %61 = vector.load %arg12[%c0_59, %c0_60] : memref<128x36xbf16, #tpu.memory_space<vmem>>, vector<128x36xbf16>
    %c0_61 = arith.constant 0 : index
    %c0_62 = arith.constant 0 : index
    %62 = vector.load %arg5[%c0_61, %c0_62] : memref<36x64xbf16, #tpu.memory_space<vmem>>, vector<36x64xbf16>
    %cst_63 = arith.constant dense<0.000000e+00> : vector<128x64xf32>
    %63 = tpu.matmul %61, %62, %cst_63 {dimension_numbers = #tpu.dot_dimension_numbers<[1], [0], [0], [1], [0, 0, 1, 1], [], []>} : vector<128x36xbf16>, vector<36x64xbf16>, vector<128x64xf32> -> vector<128x64xf32>
    %c0_64 = arith.constant 0 : index
    %c0_65 = arith.constant 0 : index
    %64 = vector.load %arg6[%c0_64, %c0_65] : memref<1x64xf32, #tpu.memory_space<vmem>>, vector<1x64xf32>
    %65 = vector.broadcast %64 : vector<1x64xf32> to vector<128x64xf32>
    %66 = arith.addf %63, %65 : vector<128x64xf32>
    %cst_66 = arith.constant 0.000000e+00 : f32
    %67 = vector.broadcast %cst_66 : f32 to vector<128x64xf32>
    %68 = arith.maximumf %66, %67 : vector<128x64xf32>
    %69 = arith.truncf %68 : vector<128x64xf32> to vector<128x64xbf16>
    %c0_67 = arith.constant 0 : index
    %c0_68 = arith.constant 0 : index
    %70 = vector.load %arg7[%c0_67, %c0_68] : memref<64x64xbf16, #tpu.memory_space<vmem>>, vector<64x64xbf16>
    %cst_69 = arith.constant dense<0.000000e+00> : vector<128x64xf32>
    %71 = tpu.matmul %69, %70, %cst_69 {dimension_numbers = #tpu.dot_dimension_numbers<[1], [0], [0], [1], [0, 0, 1, 1], [], []>} : vector<128x64xbf16>, vector<64x64xbf16>, vector<128x64xf32> -> vector<128x64xf32>
    %c0_70 = arith.constant 0 : index
    %c0_71 = arith.constant 0 : index
    %72 = vector.load %arg8[%c0_70, %c0_71] : memref<1x64xf32, #tpu.memory_space<vmem>>, vector<1x64xf32>
    %73 = vector.broadcast %72 : vector<1x64xf32> to vector<128x64xf32>
    %74 = arith.addf %71, %73 : vector<128x64xf32>
    %75 = tpu.transpose %74, [1, 0] : vector<128x64xf32> -> vector<64x128xf32>
    %76 = vector.extract_strided_slice %75 {offsets = [0, 0], sizes = [3, 128], strides = [1, 1]} : vector<64x128xf32> to vector<3x128xf32>
    %77 = arith.negf %76 : vector<3x128xf32>
    %78 = math.exp %77 : vector<3x128xf32>
    %cst_72 = arith.constant 1.000000e+00 : f32
    %79 = vector.broadcast %cst_72 : f32 to vector<3x128xf32>
    %80 = arith.addf %79, %78 : vector<3x128xf32>
    %81 = arith.divf %79, %80 : vector<3x128xf32>
    %cst_73 = arith.constant 9.99999974E-5 : f32
    %cst_74 = arith.constant 0.999899983 : f32
    %82 = vector.broadcast %cst_73 : f32 to vector<3x128xf32>
    %83 = arith.maximumf %82, %81 : vector<3x128xf32>
    %84 = vector.broadcast %cst_74 : f32 to vector<3x128xf32>
    %85 = arith.minimumf %84, %83 : vector<3x128xf32>
    %86 = vector.shape_cast %85 : vector<3x128xf32> to vector<1x3x128xf32>
    %c0_75 = arith.constant 0 : index
    %c0_76 = arith.constant 0 : index
    %c0_77 = arith.constant 0 : index
    %87 = vector.load %arg9[%c0_75, %c0_76, %c0_77] : memref<1x3x128xf32, #tpu.memory_space<vmem>>, vector<1x3x128xf32>
    tpu.vector_store %arg9[%c0_75, %c0_76, %c0_77], %86 {strides = array<i32>} : memref<1x3x128xf32, #tpu.memory_space<vmem>>, vector<1x3x128xf32>,
    %88 = vector.extract_strided_slice %75 {offsets = [8, 0], sizes = [50, 128], strides = [1, 1]} : vector<64x128xf32> to vector<50x128xf32>
    %89 = vector.shape_cast %88 : vector<50x128xf32> to vector<1x50x128xf32>
    %c0_78 = arith.constant 0 : index
    %c0_79 = arith.constant 0 : index
    %c0_80 = arith.constant 0 : index
    %90 = vector.load %arg10[%c0_78, %c0_79, %c0_80] : memref<1x50x128xf32, #tpu.memory_space<vmem>>, vector<1x50x128xf32>
    tpu.vector_store %arg10[%c0_78, %c0_79, %c0_80], %89 {strides = array<i32>} : memref<1x50x128xf32, #tpu.memory_space<vmem>>, vector<1x50x128xf32>,
    return
  }
  func.func @transform_0(%arg0: i32, %arg1: i32) -> (i32, i32, i32, i32) {
    %c0_i32 = arith.constant 0 : i32
    %c0_i32_0 = arith.constant 0 : i32
    %c0_i32_1 = arith.constant 0 : i32
    return %arg0, %arg1, %c0_i32, %c0_i32_0 : i32, i32, i32, i32
  }
  func.func @transform_1(%arg0: i32, %arg1: i32) -> (i32, i32, i32, i32) {
    %c8_i32 = arith.constant 8 : i32
    %0 = arith.muli %arg1, %c8_i32 : i32
    %c1_i32 = arith.constant 1 : i32
    %1 = arith.subi %0, %c1_i32 : i32
    %c0_i32 = arith.constant 0 : i32
    %2 = arith.maxsi %1, %c0_i32 : i32
    %c0_i32_0 = arith.constant 0 : i32
    %c0_i32_1 = arith.constant 0 : i32
    %c0_i32_2 = arith.constant 0 : i32
    return %arg0, %2, %c0_i32_0, %c0_i32_1 : i32, i32, i32, i32
  }
  func.func @transform_2(%arg0: i32, %arg1: i32) -> (i32, i32, i32, i32) {
    %c1_i32 = arith.constant 1 : i32
    %0 = arith.addi %arg1, %c1_i32 : i32
    %c8_i32 = arith.constant 8 : i32
    %1 = arith.muli %0, %c8_i32 : i32
    %c15_i32 = arith.constant 15 : i32
    %2 = arith.minsi %1, %c15_i32 : i32
    %c0_i32 = arith.constant 0 : i32
    %c0_i32_0 = arith.constant 0 : i32
    %c0_i32_1 = arith.constant 0 : i32
    return %arg0, %2, %c0_i32, %c0_i32_0 : i32, i32, i32, i32
  }
  func.func @transform_3(%arg0: i32, %arg1: i32) -> (i32, i32) {
    %c0_i32 = arith.constant 0 : i32
    %c0_i32_0 = arith.constant 0 : i32
    %c0_i32_1 = arith.constant 0 : i32
    return %c0_i32, %c0_i32_0 : i32, i32
  }
  func.func @transform_4(%arg0: i32, %arg1: i32) -> (i32, i32) {
    %c0_i32 = arith.constant 0 : i32
    %c0_i32_0 = arith.constant 0 : i32
    %c0_i32_1 = arith.constant 0 : i32
    return %c0_i32, %c0_i32_0 : i32, i32
  }
  func.func @transform_5(%arg0: i32, %arg1: i32) -> (i32, i32) {
    %c0_i32 = arith.constant 0 : i32
    %c0_i32_0 = arith.constant 0 : i32
    %c0_i32_1 = arith.constant 0 : i32
    return %c0_i32, %c0_i32_0 : i32, i32
  }
  func.func @transform_6(%arg0: i32, %arg1: i32) -> (i32, i32) {
    %c0_i32 = arith.constant 0 : i32
    %c0_i32_0 = arith.constant 0 : i32
    %c0_i32_1 = arith.constant 0 : i32
    return %c0_i32, %c0_i32_0 : i32, i32
  }
  func.func @transform_7(%arg0: i32, %arg1: i32) -> (i32, i32, i32) {
    %c0_i32 = arith.constant 0 : i32
    %c0_i32_0 = arith.constant 0 : i32
    return %arg0, %c0_i32, %arg1 : i32, i32, i32
  }
  func.func @transform_8(%arg0: i32, %arg1: i32) -> (i32, i32, i32) {
    %c0_i32 = arith.constant 0 : i32
    %c0_i32_0 = arith.constant 0 : i32
    return %arg0, %c0_i32, %arg1 : i32, i32, i32
  }
}

</mosaic_0001>

<bundles_post_ra>
// kernel: monoflex_center_head_forward.1
= control target key start
LH: loop header
LB: loop body
LE: loop exit
PB: predicated region body
PF: predicated region fallthrough
CT: control target
= control target key end

     0   :  { %s2127_s27 = smov 0   ;;  %s2129_s28 = smov 0   ;;  %s2548_s0 = inlined_call_operand.vmem [shape: bf16[2,16,16,4], index: 0, kind: input, shape index: {}, may-alias: {0,1,2}]   ;;  %s2549_s1 = inlined_call_operand.vmem [shape: bf16[2,16,16,4], index: 1, kind: input, shape index: {}, may-alias: {0,1,2}]   ;;  %s2550_s2 = inlined_call_operand.vmem [shape: bf16[2,16,16,4], index: 2, kind: input, shape index: {}, may-alias: {0,1,2}]   ;;  %s2551_s3 = inlined_call_operand.vmem [shape: bf16[36,64], index: 3, kind: input, shape index: {}]   ;;  %s2552_s4 = inlined_call_operand.vmem [shape: f32[1,64], index: 4, kind: input, shape index: {}]   ;;  %s2553_s5 = inlined_call_operand.vmem [shape: bf16[64,64], index: 5, kind: input, shape index: {}]   ;;  %s2554_s6 = inlined_call_operand.vmem [shape: f32[1,64], index: 6, kind: input, shape index: {}]   ;;  %s2555_s7 = inlined_call_operand.vmem [shape: f32[2,3,256], index: 7, kind: output, shape index: {0}]   ;;  %s2556_s8 = inlined_call_operand.vmem [shape: f32[2,50,256], index: 8, kind: output, shape index: {1}]  }
   0x1   :  { %s2131_s29 = smov 0   ;;  %s2133_s30 = smov 0  }
   0x2   :  { %s2135_s9 = smov 0   ;;  %s2137_s10 = smov 0  }
   0x3   :  { %s2139_s11 = smov 0  }
   0x4 LB: > { %s28_s12 = sadd.s32 1, %s2063_s9  ;;  %s31_s13 = sadd.s32 1, %s2067_s10  ;;  %s2071_s11 = sphi %s2139_s11, %s19_s11   ;;  %s2067_s10 = sphi %s2137_s10, %s2570_s10   ;;  %s2063_s9 = sphi %s2135_s9, %s2569_s9   ;;  %s2059_s30 = sphi %s2133_s30, %s2568_s30   ;;  %s2055_s29 = sphi %s2131_s29, %s2567_s29   ;;  %s2051_s28 = sphi %s2129_s28, %s2566_s28   ;;  %s2047_s27 = sphi %s2127_s27, %s2565_s27  }
   0x5   : > { %p29_p0 = scmp.ge.s32.totalorder %s28_s12, 2  ;;  %s1751_s14 = sadd.s32 4294967295, %s2071_s11  }
   0x6   : > { %p262_p1 = scmp.ne.s32.totalorder %s2051_s28, %s2047_s27  ;;  %p263_p2 = scmp.eq.s32.totalorder %s1751_s14, 3 }
   0x7   : > { %s2572_s12 = smov (%p29_p0, %s28_s12), 0  ;;  %s2574_s13 = smov (!%p29_p0, %s31_s13), %s2067_s10 }
   0x8   : > { %s248_s15 = ssub.s32 %s2063_s9, %s2572_s12  ;;  %p33_p3 = scmp.ge.s32.totalorder %s2574_s13, 2 }
   0x9   : > { %p1761_p4 = scmp.ge.s32.totalorder %s2071_s11, 1  ;;  %p2173_p5 = por %p263_p2, %p262_p1 }
   0xa   : > { %p353_p6 = scmp.lt.s32.totalorder %s2071_s11, 5  ;;  %s2576_s13 = smov (%p33_p3, %s2574_s13), 0 }
   0xb   : > { %s247_s17 = ssub.s32 %s2067_s10, %s2576_s13  ;;  %s252_s19 = sadd.s32 1, %s2051_s28 }
   0xc   : > { %p354_p7 = pnand %p1761_p4, %p353_p6  ;;  %s249_s18 = sor.u32 %s248_s15, %s247_s17 }
   0xd   : > { %p250_p8 = scmp.eq.s32.totalorder %s249_s18, 0  ;;  %s2187_s21 = sshll.u32 (!%p354_p7), %s2055_s29, 3  ;;  %vm479_vm0 = vcmask (!%p354_p7), 24576   ;;  %v2073_v0 = vmov (!%p354_p7), 0.0   ;;  %vm513_vm1 = vcmask (!%p354_p7), 31744   ;;  %vm1188_vm2 = vcmask (!%p354_p7), 1041408  }
   0xe   : > { %357 = sbr.rel (%p354_p7) target bundleno = 844 (0x34c), region = 48  ;;  %p426_p9 = scmp.lt.s32.totalorder (!%p354_p7), %s2059_s30, 1  ;;  %491 = vst.msk [vmem:[#allocation2 + $0x29] sm:$0x1] (!%p354_p7), %vm479_vm0, %v2073_v0  ;;  %480 = vst.msk [vmem:[#allocation2] sm:$0x1] (!%p354_p7), %vm479_vm0, %v2073_v0 }
   0xf   : > { %s2184_s20 = scalar_select %p250_p8, %s2051_s28, %s252_s19  }
  0x10   : > { %p428_p10 = scmp.lt.s32.totalorder (!%p354_p7), %s2187_s21, 15  ;;  %481 = vst.msk [vmem:[#allocation2 + $0x18] sm:$0x1] (!%p354_p7), %vm479_vm0, %v2073_v0  ;;  %482 = vst.msk [vmem:[#allocation2 + $0x30] sm:$0x1] (!%p354_p7), %vm479_vm0, %v2073_v0  ;;  %s2227_s19 = sadd.s32 (!%p354_p7), 4294967295, %s2187_s21 }
  0x11   : > { %483 = vst.msk [vmem:[#allocation2 + $0x48] sm:$0x1] (!%p354_p7), %vm479_vm0, %v2073_v0  ;;  %484 = vst.msk [vmem:[#allocation2 + $0x60] sm:$0x1] (!%p354_p7), %vm479_vm0, %v2073_v0  ;;  %p438_p11 = scmp.gt.s32.totalorder (!%p354_p7), %s2227_s19, 0  ;;  %p1768_p12 = scmp.lt.s32.totalorder (!%p354_p7), %s2227_s19, 15 }
  0x12   : > { %485 = vst.msk [vmem:[#allocation2 + $0x78] sm:$0x1] (!%p354_p7), %vm479_vm0, %v2073_v0  ;;  %486 = vst.msk [vmem:[#allocation2 + $0x90] sm:$0x1] (!%p354_p7), %vm479_vm0, %v2073_v0  ;;  %p500_p13 = scmp.gt.s32.totalorder (!%p354_p7), %s2055_s29, 0  ;;  %p472_p1 = scmp.lt.s32.totalorder (!%p354_p7), %s2055_s29, 1 }
  0x13   : > { %487 = vst.msk [vmem:[#allocation2 + $0xa8] sm:$0x1] (!%p354_p7), %vm479_vm0, %v2073_v0  ;;  %488 = vst.msk [vmem:[#allocation2 + $0xc0] sm:$0x1] (!%p354_p7), %vm479_vm0, %v2073_v0  ;;  %s2557_s15 = smov (!%p354_p7), 12   ;;  %vm663_vm3 = vcmask (!%p354_p7), 64544  }
  0x14   : > { %489 = vst.msk [vmem:[#allocation2 + $0xd8] sm:$0x1] (!%p354_p7), %vm479_vm0, %v2073_v0  ;;  %490 = vst.msk [vmem:[#allocation2 + $0x11] sm:$0x1] (!%p354_p7), %vm479_vm0, %v2073_v0  ;;  %vm728_vm4 = vcmask (!%p354_p7), 97344   ;;  %vm793_vm5 = vcmask (!%p354_p7), 130144  }
  0x15   : > { %492 = vst.msk [vmem:[#allocation2 + $0x41] sm:$0x1] %vm479_vm0, %v2073_v0  ;;  %493 = vst.msk [vmem:[#allocation2 + $0x59] sm:$0x1] %vm479_vm0, %v2073_v0  ;;  %s2214_s22 = scalar_select %p426_p9, %s2059_s30, 1  ;;  %vm858_vm6 = vcmask 162944  }
  0x16   : > { %494 = vst.msk [vmem:[#allocation2 + $0x71] sm:$0x1] %vm479_vm0, %v2073_v0  ;;  %495 = vst.msk [vmem:[#allocation2 + $0x89] sm:$0x1] %vm479_vm0, %v2073_v0  ;;  %s429_s23 = scalar_select %p428_p10, %s2187_s21, 15  ;;  %vm923_vm7 = vcmask 195744  }
  0x17   : > { %496 = vst.msk [vmem:[#allocation2 + $0xa1] sm:$0x1] %vm479_vm0, %v2073_v0  ;;  %497 = vst.msk [vmem:[#allocation2 + $0xb9] sm:$0x1] %vm479_vm0, %v2073_v0  ;;  %s2220_s24 = sshll.u32 %s2214_s22, 5  ;;  %vm989_vm8 = vcmask 228544  }
  0x18   : > { %498 = vst.msk [vmem:[#allocation2 + $0xd1] sm:$0x1] %vm479_vm0, %v2073_v0  ;;  %499 = vst.msk [vmem:[#allocation2 + $0xe9] sm:$0x1] %vm479_vm0, %v2073_v0  ;;  %s1763_s25 = sshll.u32 %s429_s23, 1  ;;  %vm1054_vm9 = vcmask 261344  }
  0x19   : > { %s432_s26 = sadd.s32 %s2220_s24, %s1763_s25  ;;  %vm1119_vm10 = vcmask 294144   ;;  %vm1163_vm11 = vcmask 293888   ;;  %vm1352_vm12 = vcmask 523264  }
  0x1a   : > { %s1765_s14 = sshll.u32 %s432_s26, 2  ;;  %s1821_s26 = sadd.s32 8, %s2187_s21 }
  0x1b   : > { %s434_s18 = scalar_lea.vmem %s2548_s0, %s1765_s14  ;;  %p2258_p0 = scmp.lt.s32.totalorder %s1821_s26, 15 }
  0x1c   : > { %v1831_v1 = vld [vmem:[%s434_s18] sm:$0xff]   ;;  %v1862_v2 = vld [vmem:[%s434_s18 + $0x8] sm:$0xff]   ;;  %v1863_v3 = vld [vmem:[%s434_s18 + $0x10] sm:$0xff]   ;;  %s439_s23 = scalar_select %p438_p11, %s2227_s19, 0 }
  0x1d   : > { %v1832_v4 = vunpack.c.l.bf16 %v1831_v1  ;;  %v1833_v5 = vunpack.c.h.bf16 %v1831_v1  ;;  %v1836_v6 = vunpack.c.l.bf16 %v1862_v2  ;;  %v1837_v7 = vunpack.c.h.bf16 %v1862_v2  ;;  %v1864_v8 = vld [vmem:[%s434_s18 + $0x18] sm:$0xff]   ;;  %v1865_v9 = vld [vmem:[%s434_s18 + $0x20] sm:$0xff]   ;;  %v1866_v10 = vld [vmem:[%s434_s18 + $0x28] sm:$0xff]   ;;  %s2243_s25 = scalar_select %p500_p13, 1, 0 }
  0x1e   : > { %v1840_v11 = vunpack.c.l.bf16 %v1863_v3  ;;  %v1841_v12 = vunpack.c.h.bf16 %v1863_v3  ;;  %v1844_v13 = vunpack.c.l.bf16 %v1864_v8  ;;  %v1845_v14 = vunpack.c.h.bf16 %v1864_v8  ;;  %v1867_v15 = vld [vmem:[%s434_s18 + $0x30] sm:$0xff]   ;;  %v1868_v16 = vld [vmem:[%s434_s18 + $0x38] sm:$0xff]   ;;  %s2578_s23 = smov (!%p1768_p12, %s439_s23), 15  ;;  %s2580_s26 = smov (!%p2258_p0, %s1821_s26), 15  ;;  %v2006_v2 = vld [vmem:[%s2551_s3] sm:$0xff]  }
  0x1f   : > { %559 = vst.msk [vmem:[#allocation2 + $0x19] sm:$0xff] %vm513_vm1, %v1832_v4  ;;  %560 = vst.msk [vmem:[#allocation2 + $0x21] sm:$0xff] %vm513_vm1, %v1833_v5  ;;  %v1848_v17 = vunpack.c.l.bf16 %v1865_v9  ;;  %v1849_v18 = vunpack.c.h.bf16 %v1865_v9  ;;  %v1852_v19 = vunpack.c.l.bf16 %v1866_v10  ;;  %v1853_v20 = vunpack.c.h.bf16 %v1866_v10  ;;  %s1773_s14 = sshll.u32 %s2578_s23, 1  ;;  %s502_s19 = scvt.s32.f32 %s2243_s25  ;;  %1892 = vmatprep.subr.bf16.mxu0 %v2006_v2 }
  0x20   : > { %561 = vst.msk [vmem:[#allocation2 + $0x31] sm:$0xff] %vm513_vm1, %v1836_v6  ;;  %562 = vst.msk [vmem:[#allocation2 + $0x39] sm:$0xff] %vm513_vm1, %v1837_v7  ;;  %v1856_v21 = vunpack.c.l.bf16 %v1867_v15  ;;  %v1857_v22 = vunpack.c.h.bf16 %v1867_v15  ;;  %v1860_v23 = vunpack.c.l.bf16 %v1868_v16  ;;  %v1861_v24 = vunpack.c.h.bf16 %v1868_v16  ;;  %s446_s17 = sadd.s32 %s1773_s14, %s2220_s24  ;;  %s2582_s26 = smov (!%p2258_p0, %s2580_s26), 15  ;;  %1893 = vmatpush3.bf16.msra.mxu0 %v2006_v2  ;;  %v2007_v15 = vld [vmem:[%s2551_s3 + $0x8] sm:$0xff]  }
  0x21   : > { %563 = vst.msk [vmem:[#allocation2 + $0x49] sm:$0xff] %vm513_vm1, %v1840_v11  ;;  %564 = vst.msk [vmem:[#allocation2 + $0x51] sm:$0xff] %vm513_vm1, %v1841_v12  ;;  %s1775_s18 = sshll.u32 %s446_s17, 2  ;;  %s2074_s17 = smov 4   ;;  %v510_v43 = vstv %s502_s19  ;;  %1894 = vmatprep.subr.bf16.mxu0 %v2007_v15 }
  0x22   : > { %565 = vst.msk [vmem:[#allocation2 + $0x61] sm:$0xff] %vm513_vm1, %v1844_v13  ;;  %566 = vst.msk [vmem:[#allocation2 + $0x69] sm:$0xff] %vm513_vm1, %v1845_v14  ;;  %s448_s14 = scalar_lea.vmem %s2549_s1, %s1775_s18  ;;  %s2075_s25 = smov 8  }
  0x23   : > { %567 = vst.msk [vmem:[#allocation2 + $0x79] sm:$0xff] %vm513_vm1, %v1848_v17  ;;  %568 = vst.msk [vmem:[#allocation2 + $0x81] sm:$0xff] %vm513_vm1, %v1849_v18  ;;  %v1823_v42 = vld [vmem:[%s448_s14] sm:$0xff]   ;;  %s1780_s18 = sshll.u32 %s2582_s26, 1  ;;  %s2559_s19 = smov 16  }
  0x24   : > { %569 = vst.msk [vmem:[#allocation2 + $0x91] sm:$0xff] %vm513_vm1, %v1852_v19  ;;  %570 = vst.msk [vmem:[#allocation2 + $0x99] sm:$0xff] %vm513_vm1, %v1853_v20  ;;  %v1824_v44 = vunpack.c.l.bf16 %v1823_v42  ;;  %v1825_v45 = vunpack.c.h.bf16 %v1823_v42  ;;  %s463_s21 = sadd.s32 %s1780_s18, %s2220_s24  ;;  %s2080_s14 = smov 28   ;;  %1895 = vmatpush3.bf16.msra.mxu0 %v2007_v15  ;;  %v2008_v20 = vld [vmem:[%s2551_s3 + $0x10] ss:$0 sps:$4 sm:$0x33]  }
  0x25   : > { %571 = vst.msk [vmem:[#allocation2 + $0xa9] sm:$0xff] %vm513_vm1, %v1856_v21  ;;  %572 = vst.msk [vmem:[#allocation2 + $0xb1] sm:$0xff] %vm513_vm1, %v1857_v22  ;;  %s504_s26 = scalar_select %p472_p1, 1, 0  ;;  %1938 = vmatprep.subr.msk.bf16.mxu0 %vm1188_vm2, %v2008_v20  ;;  %v1190_v21 = vsel %vm1188_vm2, %v2008_v20, 0 }
  0x26   : > { %573 = vst.msk [vmem:[#allocation2 + $0xc1] sm:$0xff] %vm513_vm1, %v1860_v23  ;;  %574 = vst.msk [vmem:[#allocation2 + $0xc9] sm:$0xff] %vm513_vm1, %v1861_v24  ;;  %v609_v25 = vld [vmem:[#allocation2 + $0x19] sm:$0xff]  ;;  %v610_v26 = vld [vmem:[#allocation2 + $0x21] sm:$0xff]  ;;  %v511_v50 = vmul.f32 %v1824_v44, %v510_v43  ;;  %v512_v51 = vmul.f32 %v1825_v45, %v510_v43  ;;  %s1782_s24 = sshll.u32 %s463_s21, 2 }
  0x27   : > { %v674_v27 = vld [vmem:[#allocation2 + $0x1a] sm:$0xff]  ;;  %v624_v28 = vpack.c.bf16 %v610_v26, %v609_v25  ;;  %v675_v29 = vld [vmem:[#allocation2 + $0x22] sm:$0xff]  ;;  %v739_v34 = vld [vmem:[#allocation2 + $0x30] sm:$0xff]  ;;  %s505_s23 = scvt.s32.f32 %s504_s26  ;;  %s465_s21 = scalar_lea.vmem %s2550_s2, %s1782_s24 }
  0x28   : > { %v737_v30 = vld [vmem:[#allocation2 + $0x18] sm:$0xff]  ;;  %v738_v31 = vld [vmem:[#allocation2 + $0x20] sm:$0xff]  ;;  %v689_v32 = vpack.c.bf16 %v675_v29, %v674_v27  ;;  %v935_v37 = vld [vmem:[#allocation2 + $0x48] sm:$0xff]  ;;  %514 = vst.msk [vmem:[#allocation2 + $0x1] sm:$0xff] %vm513_vm1, %v511_v50  ;;  %s2079_s24 = smov 24   ;;  %1897 = vmatpush3.bf16.msra.mxu0 %v1190_v21  ;;  %s2081_s26 = smov 32  }
  0x29   : > { %v753_v33 = vpack.c.bf16 %v738_v31, %v737_v30  ;;  %v740_v35 = vld [vmem:[#allocation2 + $0x38] sm:$0xff]  ;;  %641 = vrot.lane.b32.xlu0 %v624_v28, %s2074_s17  ;;  %v936_v38 = vld [vmem:[#allocation2 + $0x50] sm:$0xff]  ;;  %v743_v46 = vld [vmem:[#allocation2 + $0x60] sm:$0xff]  ;;  %515 = vst.msk [vmem:[#allocation2 + $0x9] sm:$0xff] %vm513_vm1, %v512_v51  ;;  %v520_v1 = vstv %s505_s23  ;;  %s2564_s23 = smov 16  }
  0x2a   : > { %v2270_v36 = vpack.c.bf16 %v740_v35, %v739_v34  ;;  %706 = vrot.lane.b32.xlu1 %v689_v32, %s2075_s25  ;;  %v804_v39 = vld [vmem:[#allocation2 + $0x31] sm:$0xff]  ;;  %v805_v40 = vld [vmem:[#allocation2 + $0x39] sm:$0xff]  ;;  %v2277_v41 = vpack.c.bf16 %v936_v38, %v935_v37  ;;  %v744_v47 = vld [vmem:[#allocation2 + $0x68] sm:$0xff] }
  0x2b   : > { %600 = vst.msk [vmem:[#allocation3 + $0x8] sm:$0xff] %vm513_vm1, %v753_v33  ;;  %v2282_v48 = vpack.c.bf16 %v744_v47, %v743_v46  ;;  %v2289_v49 = vpack.c.bf16 %v805_v40, %v804_v39  ;;  %v939_v52 = vld [vmem:[#allocation2 + $0x78] sm:$0xff]  ;;  %v940_v53 = vld [vmem:[#allocation2 + $0x80] sm:$0xff]  ;;  %v747_v57 = vld [vmem:[#allocation2 + $0x90] sm:$0xff] }
  0x2c   : > { %601 = vst.msk [vmem:[#allocation3 + $0x10] sm:$0xff] %vm513_vm1, %v2270_v36  ;;  %602 = vst.msk [vmem:[#allocation3 + $0x18] sm:$0xff] %vm513_vm1, %v2277_v41  ;;  %v869_v54 = vld [vmem:[#allocation2 + $0x32] sm:$0xff]  ;;  %v870_v55 = vld [vmem:[#allocation2 + $0x3a] sm:$0xff]  ;;  %v2293_v56 = vpack.c.bf16 %v940_v53, %v939_v52 }
  0x2d   : > { %769 = vrot.lane.b32.xlu0 %v753_v33, %s2557_s15  ;;  %603 = vst.msk [vmem:[#allocation3 + $0x20] sm:$0xff] %vm513_vm1, %v2282_v48  ;;  %v748_v58 = vld [vmem:[#allocation2 + $0x98] sm:$0xff]  ;;  %v884_v60 = vpack.c.bf16 %v870_v55, %v869_v54  ;;  %v943_v61 = vld [vmem:[#allocation2 + $0xa8] sm:$0xff]  ;;  %v944_v62 = vld [vmem:[#allocation2 + $0xb0] sm:$0xff] }
  0x2e   : > { %771 = vrot.lane.b32.xlu1 %v2270_v36, %s2557_s15  ;;  %v2300_v59 = vpack.c.bf16 %v748_v58, %v747_v57  ;;  %604 = vst.msk [vmem:[#allocation3 + $0x28] sm:$0xff] %vm513_vm1, %v2293_v56  ;;  %v2306_v63 = vpack.c.bf16 %v944_v62, %v943_v61  ;;  %s2078_s15 = smov 20   ;;  %v1827_v0 = vld [vmem:[%s465_s21] sm:$0xff]   ;;  %v1000_v3 = vld [vmem:[#allocation2 + $0x49] sm:$0xff]  ;;  %v1001_v4 = vld [vmem:[#allocation2 + $0x51] sm:$0xff] }
  0x2f   : > { %v1828_v5 = vunpack.c.l.bf16 %v1827_v0  ;;  %v1829_v6 = vunpack.c.h.bf16 %v1827_v0  ;;  %v575_v7 = vld [vmem:[#allocation2] sm:$0xff]  ;;  %v1015_v12 = vpack.c.bf16 %v1001_v4, %v1000_v3  ;;  %v1065_v22 = vld [vmem:[#allocation2 + $0x4a] sm:$0xff]  ;;  %v1066_v23 = vld [vmem:[#allocation2 + $0x52] sm:$0xff] }
  0x30   : > { %605 = vst.msk [vmem:[#allocation3 + $0x30] sm:$0xff] %vm513_vm1, %v2300_v59  ;;  %606 = vst.msk [vmem:[#allocation3 + $0x38] sm:$0xff] %vm513_vm1, %v2306_v63  ;;  %v576_v8 = vld [vmem:[#allocation2 + $0x8] sm:$0xff]  ;;  %v1080_v24 = vpack.c.bf16 %v1066_v23, %v1065_v22  ;;  %v1004_v31 = vld [vmem:[#allocation2 + $0x79] sm:$0xff] }
  0x31   : > { %834 = vrot.lane.b32.xlu0 %v624_v28, %s2559_s19  ;;  %v521_v9 = vmul.f32 %v1828_v5, %v520_v1  ;;  %v522_v10 = vmul.f32 %v1829_v6, %v520_v1  ;;  %v591_v11 = vpack.c.bf16 %v576_v8, %v575_v7  ;;  %v607_v13 = vld [vmem:[#allocation2 + $0x1] sm:$0xff]  ;;  %v608_v14 = vld [vmem:[#allocation2 + $0x9] sm:$0xff]  ;;  %v812_v37 = vld [vmem:[#allocation2 + $0x91] sm:$0xff] }
  0x32   : > { %836 = vrot.lane.b32.xlu1 %v2289_v49, %s2559_s19  ;;  %v672_v16 = vld [vmem:[#allocation2 + $0x2] sm:$0xff]  ;;  %v673_v17 = vld [vmem:[#allocation2 + $0xa] sm:$0xff]  ;;  %v623_v18 = vpack.c.bf16 %v608_v14, %v607_v13  ;;  %s2563_s19 = smov 12   ;;  %v1069_v34 = vld [vmem:[#allocation2 + $0x7a] sm:$0xff] }
  0x33   : > { %524 = vst.msk [vmem:[#allocation2 + $0xd9] sm:$0xff] %vm513_vm1, %v521_v9  ;;  %525 = vst.msk [vmem:[#allocation2 + $0xe1] sm:$0xff] %vm513_vm1, %v522_v10  ;;  %v688_v19 = vpack.c.bf16 %v673_v17, %v672_v16  ;;  %v808_v25 = vld [vmem:[#allocation2 + $0x61] sm:$0xff]  ;;  %v809_v26 = vld [vmem:[#allocation2 + $0x69] sm:$0xff] }
  0x34   : > { %599 = vst.msk [vmem:[#allocation3] sm:$0xff] %vm513_vm1, %v591_v11  ;;  %v821_v27 = vpack.c.bf16 %v809_v26, %v808_v25  ;;  %v873_v28 = vld [vmem:[#allocation2 + $0x62] sm:$0xff]  ;;  %v874_v29 = vld [vmem:[#allocation2 + $0x6a] sm:$0xff]  ;;  %v813_v38 = vld [vmem:[#allocation2 + $0x99] sm:$0xff] }
  0x35   : > { %899 = vrot.lane.b32.xlu0 %v689_v32, %s2078_s15  ;;  %v886_v30 = vpack.c.bf16 %v874_v29, %v873_v28  ;;  %v1005_v32 = vld [vmem:[#allocation2 + $0x81] sm:$0xff]  ;;  %v823_v39 = vpack.c.bf16 %v813_v38, %v812_v37  ;;  %v877_v40 = vld [vmem:[#allocation2 + $0x92] sm:$0xff]  ;;  %v1008_v43 = vld [vmem:[#allocation2 + $0xa9] sm:$0xff] }
  0x36   : > { %901 = vrot.lane.b32.xlu1 %v884_v60, %s2078_s15  ;;  %v1017_v33 = vpack.c.bf16 %v1005_v32, %v1004_v31  ;;  %v1070_v35 = vld [vmem:[#allocation2 + $0x82] sm:$0xff]  ;;  %v1009_v44 = vld [vmem:[#allocation2 + $0xb1] sm:$0xff] }
  0x37   : > { %v1019_v45 = vpack.c.bf16 %v1009_v44, %v1008_v43  ;;  %v1073_v46 = vld [vmem:[#allocation2 + $0xaa] sm:$0xff]  ;;  %v1074_v47 = vld [vmem:[#allocation2 + $0xb2] sm:$0xff]  ;;  %v816_v52 = vld [vmem:[#allocation2 + $0xc1] sm:$0xff] }
  0x38   : > { %v752_v50 = vld [vmem:[#allocation2 + $0xc8] sm:$0xff]  ;;  %v2009_v6 = vld [vmem:[%s2553_s5] sm:$0xff]  }
  0x39   : > { %965 = vrot.lane.b32.xlu0 %v2270_v36, %s2079_s24  ;;  %v1082_v36 = vpack.c.bf16 %v1070_v35, %v1069_v34  ;;  %v817_v53 = vld [vmem:[#allocation2 + $0xc9] sm:$0xff]  ;;  %1914 = vmatprep.subr.bf16.mxu1 %v2009_v6 }
  0x3a   : > { %967 = vrot.lane.b32.xlu1 %v2277_v41, %s2079_s24  ;;  %v825_v54 = vpack.c.bf16 %v817_v53, %v816_v52  ;;  %v881_v55 = vld [vmem:[#allocation2 + $0xc2] sm:$0xff]  ;;  %v947_v58 = vld [vmem:[#allocation2 + $0xd8] sm:$0xff]  ;;  %1915 = vmatpush3.bf16.msra.mxu1 %v2009_v6 }
  0x3b   : > { %v1012_v62 = vld [vmem:[#allocation2 + $0xd9] sm:$0xff]  ;;  %v1078_v4 = vld [vmem:[#allocation2 + $0xe2] sm:$0xff] }
  0x3c   : > { %v1077_v3 = vld [vmem:[#allocation2 + $0xda] sm:$0xff]  ;;  %v2010_v7 = vld [vmem:[%s2553_s5 + $0x8] sm:$0xff]  }
  0x3d   : > { %1030 = vrot.lane.b32.xlu0 %v2289_v49, %s2080_s14  ;;  %v1086_v8 = vpack.c.bf16 %v1078_v4, %v1077_v3  ;;  %1916 = vmatprep.subr.bf16.mxu1 %v2010_v7 }
  0x3e   : > { %1032 = vrot.lane.b32.xlu1 %v1015_v12, %s2080_s14  ;;  %1917 = vmatpush3.bf16.msra.mxu1 %v2010_v7 }
  0x41   : > { %639 = vrot.lane.b32.xlu0 %v623_v18, %s2074_s17 }
  0x42   : > { %704 = vrot.lane.b32.xlu1 %v688_v19, %s2075_s25 }
  0x45   : > { %1095 = vrot.lane.b32.xlu0 %v884_v60, %s2081_s26 }
  0x46   : > { %643 = vrot.lane.b32.xlu1 %v2289_v49, %s2074_s17  ;;  %v751_v49 = vld [vmem:[#allocation2 + $0xc0] sm:$0xff] }
  0x47   : > { %v760_v51 = vpack.c.bf16 %v752_v50, %v751_v49 }
  0x49   : > { %1097 = vrot.lane.b32.xlu0 %v1080_v24, %s2081_s26 }
  0x4a   : > { %645 = vrot.lane.b32.xlu1 %v1015_v12, %s2074_s17 }
  0x4d   : > { %708 = vrot.lane.b32.xlu0 %v884_v60, %s2075_s25 }
  0x4e   : > { %710 = vrot.lane.b32.xlu1 %v1080_v24, %s2075_s25 }
  0x51   : > { %773 = vrot.lane.b32.xlu0 %v2277_v41, %s2563_s19  ;;  %v878_v41 = vld [vmem:[#allocation2 + $0x9a] sm:$0xff] }
  0x52   : > { %775 = vrot.lane.b32.xlu1 %v2282_v48, %s2563_s19  ;;  %v888_v42 = vpack.c.bf16 %v878_v41, %v877_v40 }
  0x55   : > { %838 = vrot.lane.b32.xlu0 %v1015_v12, %s2564_s23 }
  0x56   : > { %840 = vrot.lane.b32.xlu1 %v821_v27, %s2564_s23 }
  0x59   : > { %903 = vrot.lane.b32.xlu0 %v1080_v24, %s2078_s15 }
  0x5a   : > { %905 = vrot.lane.b32.xlu1 %v886_v30, %s2078_s15 }
  0x5d   : > { %969 = vrot.lane.b32.xlu0 %v2282_v48, %s2079_s24  ;;  %v1084_v48 = vpack.c.bf16 %v1074_v47, %v1073_v46 }
  0x5e   : > { %971 = vrot.lane.b32.xlu1 %v2293_v56, %s2079_s24 }
  0x61   : > { %1034 = vrot.lane.b32.xlu0 %v821_v27, %s2080_s14 }
  0x62   : > { %1036 = vrot.lane.b32.xlu1 %v1017_v33, %s2080_s14 }
  0x65   : > { %1099 = vrot.lane.b32.xlu0 %v886_v30, %s2081_s26 }
  0x66   : > { %647 = vrot.lane.b32.xlu1 %v821_v27, %s2074_s17 }
  0x69   : > { %1101 = vrot.lane.b32.xlu0 %v1082_v36, %s2081_s26 }
  0x6a   : > { %649 = vrot.lane.b32.xlu1 %v1017_v33, %s2074_s17 }
  0x6d   : > { %712 = vrot.lane.b32.xlu0 %v886_v30, %s2075_s25 }
  0x6e   : > { %714 = vrot.lane.b32.xlu1 %v1082_v36, %s2075_s25 }
  0x71   : > { %777 = vrot.lane.b32.xlu0 %v2293_v56, %s2563_s19  ;;  %v882_v56 = vld [vmem:[#allocation2 + $0xca] sm:$0xff] }
  0x72   : > { %779 = vrot.lane.b32.xlu1 %v2300_v59, %s2563_s19  ;;  %v890_v57 = vpack.c.bf16 %v882_v56, %v881_v55 }
  0x75   : > { %842 = vrot.lane.b32.xlu0 %v1017_v33, %s2564_s23 }
  0x76   : > { %844 = vrot.lane.b32.xlu1 %v823_v39, %s2564_s23 }
  0x79   : > { %907 = vrot.lane.b32.xlu0 %v1082_v36, %s2078_s15 }
  0x7a   : > { %909 = vrot.lane.b32.xlu1 %v888_v42, %s2078_s15 }
  0x7d   : > { %973 = vrot.lane.b32.xlu0 %v2300_v59, %s2079_s24  ;;  %v948_v59 = vld [vmem:[#allocation2 + $0xe0] sm:$0xff] }
  0x7e   : > { %975 = vrot.lane.b32.xlu1 %v2306_v63, %s2079_s24  ;;  %v956_v60 = vpack.c.bf16 %v948_v59, %v947_v58 }
  0x81   : > { %1038 = vrot.lane.b32.xlu0 %v823_v39, %s2080_s14 }
  0x82   : > { %1040 = vrot.lane.b32.xlu1 %v1019_v45, %s2080_s14 }
  0x85   : > { %1103 = vrot.lane.b32.xlu0 %v888_v42, %s2081_s26 }
  0x86   : > { %651 = vrot.lane.b32.xlu1 %v823_v39, %s2074_s17 }
  0x89   : > { %1105 = vrot.lane.b32.xlu0 %v1084_v48, %s2081_s26 }
  0x8a   : > { %653 = vrot.lane.b32.xlu1 %v1019_v45, %s2074_s17 }
  0x8d   : > { %716 = vrot.lane.b32.xlu0 %v888_v42, %s2075_s25 }
  0x8e   : > { %718 = vrot.lane.b32.xlu1 %v1084_v48, %s2075_s25 }
  0x91   : > { %781 = vrot.lane.b32.xlu0 %v2306_v63, %s2563_s19  ;;  %v1013_v63 = vld [vmem:[#allocation2 + $0xe1] sm:$0xff] }
  0x92   : > { %783 = vrot.lane.b32.xlu1 %v760_v51, %s2563_s19  ;;  %v1021_v1 = vpack.c.bf16 %v1013_v63, %v1012_v62 }
  0x95   : > { %846 = vrot.lane.b32.xlu0 %v1019_v45, %s2564_s23 }
  0x96   : > { %848 = vrot.lane.b32.xlu1 %v825_v54, %s2564_s23 }
  0x99   : > { %911 = vrot.lane.b32.xlu0 %v1084_v48, %s2078_s15 }
  0x9a   : > { %913 = vrot.lane.b32.xlu1 %v890_v57, %s2078_s15  ;;  %s422_s15 = sand.u32 1, %s2047_s27  }
  0x9b   : > { %v642_v61 = vpop.permute.xlu0 %641  ;;  %s1939_s18 = smul.u32 56, %s422_s15 }
  0x9c   : > { %665 = vst.msk [vmem:[#allocation3 + $0x8] sm:$0xff] %vm663_vm3, %v642_v61  ;;  %v707_v0 = vpop.permute.xlu1 %706  ;;  %s473_s27 = scalar_select %p472_p1, %s2055_s29, 1 }
  0x9d   : > { %730 = vst.msk [vmem:[#allocation3 + $0x8] sm:$0xff] %vm728_vm4, %v707_v0  ;;  %977 = vrot.lane.b32.xlu0 %v760_v51, %s2079_s24 }
  0x9e   : > { %979 = vrot.lane.b32.xlu1 %v956_v60, %s2079_s24  ;;  %s2497_s24 = scalar_lea.vmem [#allocation4], %s1939_s18 }
  0x9f   : > { %v770_v2 = vpop.permute.xlu0 %769 }
  0xa0   : > { %v772_v5 = vpop.permute.xlu1 %771 }
  0xa1   : > { %795 = vst.msk [vmem:[#allocation3 + $0x8] sm:$0xff] %vm793_vm5, %v772_v5  ;;  %1042 = vrot.lane.b32.xlu0 %v825_v54, %s2080_s14 }
  0xa2   : > { %1044 = vrot.lane.b32.xlu1 %v1021_v1, %s2080_s14  ;;  %s1783_s14 = sshll.u32 %s2214_s22, 1  ;;  %s1940_s22 = smul.u32 (%p2173_p5), 14, %s2059_s30 }
  0xa3   : > { %v835_v9 = vpop.permute.xlu0 %834  ;;  %s475_s21 = sadd.s32 %s1783_s14, %s473_s27 }
  0xa4   : > { %v837_v10 = vpop.permute.xlu1 %836  ;;  %s1541_s25 = sadd.s32 (%p2173_p5), %s2055_s29, %s1940_s22 }
  0xa5   : > { %860 = vst.msk [vmem:[#allocation3 + $0x8] sm:$0xff] %vm858_vm6, %v837_v10  ;;  %1107 = vrot.lane.b32.xlu0 %v890_v57, %s2081_s26  ;;  %s1811_s16 = sshll.u32 (%p2173_p5), %s1541_s25, 3 }
  0xa6   : > { %1109 = vrot.lane.b32.xlu1 %v1086_v8, %s2081_s26  ;;  %s1784_s26 = sshll.u32 %s475_s21, 2  ;;  %s1543_s27 = scalar_lea.vmem (%p2173_p5), %s2556_s8, %s1811_s16 }
  0xa7   : > { %v900_v11 = vpop.permute.xlu0 %899  ;;  %s477_s17 = scalar_lea.vmem %s2555_s7, %s1784_s26 }
  0xa8   : > { %v902_v12 = vpop.permute.xlu1 %901 }
  0xa9   : > { %925 = vst.msk [vmem:[#allocation3 + $0x8] sm:$0xff] %vm923_vm7, %v902_v12  ;;  %v2012_v12 = vld [vmem:[%s2553_s5 + $0x18] sm:$0xff]  }
  0xab   : > { %v966_v13 = vpop.permute.xlu0 %965 }
  0xac   : > { %v968_v14 = vpop.permute.xlu1 %967 }
  0xad   : > { %991 = vst.msk [vmem:[#allocation3 + $0x8] sm:$0xff] %vm989_vm8, %v968_v14 }
  0xaf   : > { %v1031_v15 = vpop.permute.xlu0 %1030 }
  0xb0   : > { %v1033_v16 = vpop.permute.xlu1 %1032 }
  0xb1   : > { %1056 = vst.msk [vmem:[#allocation3 + $0x8] sm:$0xff] %vm1054_vm9, %v1033_v16 }
  0xb3   : > { %v640_v17 = vpop.permute.xlu0 %639 }
  0xb4   : > { %664 = vst.msk [vmem:[#allocation3] sm:$0xff] %vm663_vm3, %v640_v17  ;;  %v705_v18 = vpop.permute.xlu1 %704 }
  0xb5   : > { %729 = vst.msk [vmem:[#allocation3] sm:$0xff] %vm728_vm4, %v705_v18 }
  0xb6   : > { %794 = vst.msk [vmem:[#allocation3] sm:$0xff] %vm793_vm5, %v770_v2 }
  0xb7   : > { %859 = vst.msk [vmem:[#allocation3] sm:$0xff] %vm858_vm6, %v835_v9  ;;  %v1096_v19 = vpop.permute.xlu0 %1095 }
  0xb8   : > { %924 = vst.msk [vmem:[#allocation3] sm:$0xff] %vm923_vm7, %v900_v11  ;;  %v644_v20 = vpop.permute.xlu1 %643  ;;  %v2011_v11 = vld [vmem:[%s2553_s5 + $0x10] sm:$0xff]  }
  0xb9   : > { %990 = vst.msk [vmem:[#allocation3] sm:$0xff] %vm989_vm8, %v966_v13  ;;  %1918 = vmatprep.subr.bf16.mxu1 %v2011_v11 }
  0xba   : > { %666 = vst.msk [vmem:[#allocation3 + $0x10] sm:$0xff] %vm663_vm3, %v644_v20  ;;  %1919 = vmatpush3.bf16.msra.mxu1 %v2011_v11 }
  0xbb   : > { %1055 = vst.msk [vmem:[#allocation3] sm:$0xff] %vm1054_vm9, %v1031_v15  ;;  %v1098_v21 = vpop.permute.xlu0 %1097  ;;  %1920 = vmatprep.subr.bf16.mxu1 %v2012_v12  ;;  %v1785_v15 = vld [vmem:[%s2552_s4] ss:$0 sm:$0xff] }
  0xbc   : > { %1120 = vst.msk [vmem:[#allocation3] sm:$0xff] %vm1119_vm10, %v1096_v19  ;;  %1121 = vst.msk [vmem:[#allocation3 + $0x8] sm:$0xff] %vm1119_vm10, %v1098_v21  ;;  %v646_v22 = vpop.permute.xlu1 %645 }
  0xbd   : > { %667 = vst.msk [vmem:[#allocation3 + $0x18] sm:$0xff] %vm663_vm3, %v646_v22 }
  0xbe   : > { %1921 = vmatpush3.bf16.msra.mxu1 %v2012_v12 }
  0xbf   : > { %v709_v23 = vpop.permute.xlu0 %708 }
  0xc0   : > { %731 = vst.msk [vmem:[#allocation3 + $0x10] sm:$0xff] %vm728_vm4, %v709_v23  ;;  %v711_v24 = vpop.permute.xlu1 %710 }
  0xc1   : > { %732 = vst.msk [vmem:[#allocation3 + $0x18] sm:$0xff] %vm728_vm4, %v711_v24 }
  0xc3   : > { %v1128_v25 = vld [vmem:[#allocation3] sm:$0xff]  ;;  %v774_v26 = vpop.permute.xlu0 %773  ;;  %v1129_v27 = vld [vmem:[#allocation3 + $0x8] sm:$0xff] }
  0xc4   : > { %1898 = vmatprep.mubr.msk.bf16.mxu0 %vm1163_vm11, %v1128_v25  ;;  %796 = vst.msk [vmem:[#allocation3 + $0x10] sm:$0xff] %vm793_vm5, %v774_v26  ;;  %v776_v28 = vpop.permute.xlu1 %775 }
  0xc5   : > { %1899 = vmatmul.mubr.msk.bf16.vlgmr.msra.gmra.mrb[0].mxu0 %vm1163_vm11, %v1129_v27  ;;  %797 = vst.msk [vmem:[#allocation3 + $0x18] sm:$0xff] %vm793_vm5, %v776_v28 }
  0xc7   : > { %v839_v29 = vpop.permute.xlu0 %838 }
  0xc8   : > { %861 = vst.msk [vmem:[#allocation3 + $0x10] sm:$0xff] %vm858_vm6, %v839_v29  ;;  %v841_v30 = vpop.permute.xlu1 %840 }
  0xc9   : > { %862 = vst.msk [vmem:[#allocation3 + $0x18] sm:$0xff] %vm858_vm6, %v841_v30 }
  0xcb   : > { %v904_v31 = vpop.permute.xlu0 %903 }
  0xcc   : > { %926 = vst.msk [vmem:[#allocation3 + $0x10] sm:$0xff] %vm923_vm7, %v904_v31  ;;  %v906_v32 = vpop.permute.xlu1 %905 }
  0xcd   : > { %927 = vst.msk [vmem:[#allocation3 + $0x18] sm:$0xff] %vm923_vm7, %v906_v32 }
  0xcf   : > { %v970_v33 = vpop.permute.xlu0 %969 }
  0xd0   : > { %992 = vst.msk [vmem:[#allocation3 + $0x10] sm:$0xff] %vm989_vm8, %v970_v33  ;;  %v972_v34 = vpop.permute.xlu1 %971 }
  0xd1   : > { %993 = vst.msk [vmem:[#allocation3 + $0x18] sm:$0xff] %vm989_vm8, %v972_v34 }
  0xd3   : > { %v1035_v35 = vpop.permute.xlu0 %1034 }
  0xd4   : > { %1057 = vst.msk [vmem:[#allocation3 + $0x10] sm:$0xff] %vm1054_vm9, %v1035_v35  ;;  %v1037_v36 = vpop.permute.xlu1 %1036 }
  0xd5   : > { %1058 = vst.msk [vmem:[#allocation3 + $0x18] sm:$0xff] %vm1054_vm9, %v1037_v36 }
  0xd7   : > { %v1100_v37 = vpop.permute.xlu0 %1099 }
  0xd8   : > { %1122 = vst.msk [vmem:[#allocation3 + $0x10] sm:$0xff] %vm1119_vm10, %v1100_v37  ;;  %v648_v38 = vpop.permute.xlu1 %647 }
  0xd9   : > { %668 = vst.msk [vmem:[#allocation3 + $0x20] sm:$0xff] %vm663_vm3, %v648_v38 }
  0xdb   : > { %v1102_v39 = vpop.permute.xlu0 %1101 }
  0xdc   : > { %1123 = vst.msk [vmem:[#allocation3 + $0x18] sm:$0xff] %vm1119_vm10, %v1102_v39  ;;  %v650_v40 = vpop.permute.xlu1 %649 }
  0xdd   : > { %669 = vst.msk [vmem:[#allocation3 + $0x28] sm:$0xff] %vm663_vm3, %v650_v40 }
  0xdf   : > { %v713_v41 = vpop.permute.xlu0 %712  ;;  %v1130_v42 = vld [vmem:[#allocation3 + $0x10] sm:$0xff] }
  0xe0   : > { %733 = vst.msk [vmem:[#allocation3 + $0x20] sm:$0xff] %vm728_vm4, %v713_v41  ;;  %v715_v43 = vpop.permute.xlu1 %714  ;;  %1902 = vmatprep.mubr.msk.bf16.mxu0 %vm1163_vm11, %v1130_v42 }
  0xe1   : > { %734 = vst.msk [vmem:[#allocation3 + $0x28] sm:$0xff] %vm728_vm4, %v715_v43 }
  0xe3   : > { %v778_v44 = vpop.permute.xlu0 %777  ;;  %v1131_v45 = vld [vmem:[#allocation3 + $0x18] sm:$0xff] }
  0xe4   : > { %798 = vst.msk [vmem:[#allocation3 + $0x20] sm:$0xff] %vm793_vm5, %v778_v44  ;;  %v780_v46 = vpop.permute.xlu1 %779  ;;  %1903 = vmatmul.mubr.msk.bf16.gmra.mrb[4].mxu0 %vm1163_vm11, %v1131_v45 }
  0xe5   : > { %799 = vst.msk [vmem:[#allocation3 + $0x28] sm:$0xff] %vm793_vm5, %v780_v46 }
  0xe7   : > { %v843_v47 = vpop.permute.xlu0 %842 }
  0xe8   : > { %863 = vst.msk [vmem:[#allocation3 + $0x20] sm:$0xff] %vm858_vm6, %v843_v47  ;;  %v845_v48 = vpop.permute.xlu1 %844 }
  0xe9   : > { %864 = vst.msk [vmem:[#allocation3 + $0x28] sm:$0xff] %vm858_vm6, %v845_v48 }
  0xeb   : > { %v908_v49 = vpop.permute.xlu0 %907 }
  0xec   : > { %928 = vst.msk [vmem:[#allocation3 + $0x20] sm:$0xff] %vm923_vm7, %v908_v49  ;;  %v910_v50 = vpop.permute.xlu1 %909 }
  0xed   : > { %929 = vst.msk [vmem:[#allocation3 + $0x28] sm:$0xff] %vm923_vm7, %v910_v50 }
  0xef   : > { %v974_v51 = vpop.permute.xlu0 %973 }
  0xf0   : > { %994 = vst.msk [vmem:[#allocation3 + $0x20] sm:$0xff] %vm989_vm8, %v974_v51  ;;  %v976_v52 = vpop.permute.xlu1 %975 }
  0xf1   : > { %995 = vst.msk [vmem:[#allocation3 + $0x28] sm:$0xff] %vm989_vm8, %v976_v52 }
  0xf3   : > { %v1039_v53 = vpop.permute.xlu0 %1038 }
  0xf4   : > { %1059 = vst.msk [vmem:[#allocation3 + $0x20] sm:$0xff] %vm1054_vm9, %v1039_v53  ;;  %v1041_v54 = vpop.permute.xlu1 %1040 }
  0xf5   : > { %1060 = vst.msk [vmem:[#allocation3 + $0x28] sm:$0xff] %vm1054_vm9, %v1041_v54 }
  0xf7   : > { %v1104_v55 = vpop.permute.xlu0 %1103 }
  0xf8   : > { %1124 = vst.msk [vmem:[#allocation3 + $0x20] sm:$0xff] %vm1119_vm10, %v1104_v55  ;;  %v652_v56 = vpop.permute.xlu1 %651 }
  0xf9   : > { %670 = vst.msk [vmem:[#allocation3 + $0x30] sm:$0xff] %vm663_vm3, %v652_v56 }
  0xfb   : > { %v1106_v57 = vpop.permute.xlu0 %1105 }
  0xfc   : > { %1125 = vst.msk [vmem:[#allocation3 + $0x28] sm:$0xff] %vm1119_vm10, %v1106_v57  ;;  %v654_v58 = vpop.permute.xlu1 %653 }
  0xfd   : > { %671 = vst.msk [vmem:[#allocation3 + $0x38] sm:$0xff] %vm663_vm3, %v654_v58 }
  0xff   : > { %v717_v59 = vpop.permute.xlu0 %716  ;;  %v1132_v60 = vld [vmem:[#allocation3 + $0x20] sm:$0xff] }
 0x100   : > { %735 = vst.msk [vmem:[#allocation3 + $0x30] sm:$0xff] %vm728_vm4, %v717_v59  ;;  %v719_v61 = vpop.permute.xlu1 %718  ;;  %1906 = vmatprep.mubr.msk.bf16.mxu0 %vm1163_vm11, %v1132_v60 }
 0x101   : > { %736 = vst.msk [vmem:[#allocation3 + $0x38] sm:$0xff] %vm728_vm4, %v719_v61 }
 0x103   : > { %v782_v62 = vpop.permute.xlu0 %781  ;;  %v1133_v63 = vld [vmem:[#allocation3 + $0x28] sm:$0xff] }
 0x104   : > { %800 = vst.msk [vmem:[#allocation3 + $0x30] sm:$0xff] %vm793_vm5, %v782_v62  ;;  %v784_v0 = vpop.permute.xlu1 %783  ;;  %1907 = vmatmul.mubr.msk.bf16.gmra.mrb[8].mxu0 %vm1163_vm11, %v1133_v63 }
 0x105   : > { %801 = vst.msk [vmem:[#allocation3 + $0x38] sm:$0xff] %vm793_vm5, %v784_v0 }
 0x107   : > { %v847_v1 = vpop.permute.xlu0 %846 }
 0x108   : > { %865 = vst.msk [vmem:[#allocation3 + $0x30] sm:$0xff] %vm858_vm6, %v847_v1  ;;  %v849_v2 = vpop.permute.xlu1 %848 }
 0x109   : > { %866 = vst.msk [vmem:[#allocation3 + $0x38] sm:$0xff] %vm858_vm6, %v849_v2 }
 0x10b   : > { %v912_v3 = vpop.permute.xlu0 %911 }
 0x10c   : > { %930 = vst.msk [vmem:[#allocation3 + $0x30] sm:$0xff] %vm923_vm7, %v912_v3  ;;  %v914_v4 = vpop.permute.xlu1 %913 }
 0x10d   : > { %931 = vst.msk [vmem:[#allocation3 + $0x38] sm:$0xff] %vm923_vm7, %v914_v4 }
 0x10f   : > { %v978_v5 = vpop.permute.xlu0 %977 }
 0x110   : > { %996 = vst.msk [vmem:[#allocation3 + $0x30] sm:$0xff] %vm989_vm8, %v978_v5  ;;  %v980_v6 = vpop.permute.xlu1 %979 }
 0x111   : > { %997 = vst.msk [vmem:[#allocation3 + $0x38] sm:$0xff] %vm989_vm8, %v980_v6 }
 0x113   : > { %v1043_v7 = vpop.permute.xlu0 %1042 }
 0x114   : > { %1061 = vst.msk [vmem:[#allocation3 + $0x30] sm:$0xff] %vm1054_vm9, %v1043_v7  ;;  %v1045_v8 = vpop.permute.xlu1 %1044 }
 0x115   : > { %1062 = vst.msk [vmem:[#allocation3 + $0x38] sm:$0xff] %vm1054_vm9, %v1045_v8  ;;  %v1797_v8 = vld [vmem:[%s2554_s6] ss:$0 sm:$0xff] }
 0x117   : > { %v1108_v9 = vpop.permute.xlu0 %1107 }
 0x118   : > { %1126 = vst.msk [vmem:[#allocation3 + $0x30] sm:$0xff] %vm1119_vm10, %v1108_v9  ;;  %v1110_v10 = vpop.permute.xlu1 %1109 }
 0x119   : > { %1127 = vst.msk [vmem:[#allocation3 + $0x38] sm:$0xff] %vm1119_vm10, %v1110_v10 }
 0x11f   : > { %v1134_v13 = vld [vmem:[#allocation3 + $0x30] sm:$0xff] }
 0x120   : > { %1910 = vmatprep.mubr.msk.bf16.mxu0 %vm1163_vm11, %v1134_v13  ;;  %v1135_v14 = vld [vmem:[#allocation3 + $0x38] sm:$0xff] }
 0x121   : > { %1911 = vmatmul.mubr.msk.bf16.gmra.mrb[12].mxu0 %vm1163_vm11, %v1135_v14 }
 0x198   : > { %v1900_v16 = vpop.f32.mrb[0].mxu0 }
 0x199   : > { %v1235_v17 = vadd.f32 %v1900_v16, %v1785_v15  ;;  %v1226_v18 = vpop.f32.mrb[1].mxu0 }
 0x19a   : > { %v1227_v19 = vadd.f32 %v1785_v15, %v1226_v18  ;;  %v1901_v20 = vpop.f32.mrb[2].mxu0 }
 0x19b   : > { %v1238_v21 = vadd.f32 %v1901_v20, %v1785_v15  ;;  %v1229_v22 = vpop.f32.mrb[3].mxu0  ;;  %v1291_v24 = vmax.f32 %v1235_v17, 0.0 }
 0x19c   : > { %v1230_v23 = vadd.f32 %v1785_v15, %v1229_v22  ;;  %v1289_v26 = vmax.f32 %v1227_v19, 0.0 }
 0x19d   : > { %v1292_v25 = vmax.f32 %v1238_v21, 0.0 }
 0x19e   : > { %v1290_v27 = vmax.f32 %v1230_v23, 0.0 }
 0x19f   : > { %v1306_v28 = vpack.c.bf16 %v1292_v25, %v1291_v24 }
 0x1a0   : > { %v1305_v29 = vpack.c.bf16 %v1290_v27, %v1289_v26 }
 0x1a2   : > { %1922 = vmatprep.mubr.msk.bf16.mxu1 %vm1352_vm12, %v1305_v29 }
 0x1a3   : > { %1923 = vmatmul.mubr.msk.bf16.vlgmr.msra.gmra.mrb[0].mxu1 %vm1352_vm12, %v1306_v28 }
 0x1b7   : > { %v1904_v30 = vpop.f32.mrb[4].mxu0 }
 0x1b8   : > { %v1251_v31 = vadd.f32 %v1904_v30, %v1785_v15  ;;  %v1242_v32 = vpop.f32.mrb[5].mxu0 }
 0x1b9   : > { %v1243_v33 = vadd.f32 %v1785_v15, %v1242_v32  ;;  %v1905_v34 = vpop.f32.mrb[6].mxu0 }
 0x1ba   : > { %v1254_v35 = vadd.f32 %v1905_v34, %v1785_v15  ;;  %v1245_v36 = vpop.f32.mrb[7].mxu0  ;;  %v1295_v38 = vmax.f32 %v1251_v31, 0.0 }
 0x1bb   : > { %v1246_v37 = vadd.f32 %v1785_v15, %v1245_v36  ;;  %v1293_v40 = vmax.f32 %v1243_v33, 0.0 }
 0x1bc   : > { %v1296_v39 = vmax.f32 %v1254_v35, 0.0 }
 0x1bd   : > { %v1294_v41 = vmax.f32 %v1246_v37, 0.0 }
 0x1be   : > { %v1308_v42 = vpack.c.bf16 %v1296_v39, %v1295_v38 }
 0x1bf   : > { %v1307_v43 = vpack.c.bf16 %v1294_v41, %v1293_v40 }
 0x1c1   : > { %1926 = vmatprep.mubr.msk.bf16.mxu1 %vm1352_vm12, %v1307_v43 }
 0x1c2   : > { %1927 = vmatmul.mubr.msk.bf16.gmra.mrb[4].mxu1 %vm1352_vm12, %v1308_v42 }
 0x1d7   : > { %v1908_v44 = vpop.f32.mrb[8].mxu0 }
 0x1d8   : > { %v1267_v45 = vadd.f32 %v1908_v44, %v1785_v15  ;;  %v1258_v46 = vpop.f32.mrb[9].mxu0 }
 0x1d9   : > { %v1259_v47 = vadd.f32 %v1785_v15, %v1258_v46  ;;  %v1909_v48 = vpop.f32.mrb[10].mxu0 }
 0x1da   : > { %v1270_v49 = vadd.f32 %v1909_v48, %v1785_v15  ;;  %v1261_v50 = vpop.f32.mrb[11].mxu0  ;;  %v1299_v52 = vmax.f32 %v1267_v45, 0.0 }
 0x1db   : > { %v1262_v51 = vadd.f32 %v1785_v15, %v1261_v50  ;;  %v1297_v54 = vmax.f32 %v1259_v47, 0.0 }
 0x1dc   : > { %v1300_v53 = vmax.f32 %v1270_v49, 0.0 }
 0x1dd   : > { %v1298_v55 = vmax.f32 %v1262_v51, 0.0 }
 0x1de   : > { %v1310_v56 = vpack.c.bf16 %v1300_v53, %v1299_v52 }
 0x1df   : > { %v1309_v57 = vpack.c.bf16 %v1298_v55, %v1297_v54 }
 0x1e1   : > { %1930 = vmatprep.mubr.msk.bf16.mxu1 %vm1352_vm12, %v1309_v57 }
 0x1e2   : > { %1931 = vmatmul.mubr.msk.bf16.gmra.mrb[8].mxu1 %vm1352_vm12, %v1310_v56 }
 0x1f4   : > { %v1912_v58 = vpop.f32.mrb[12].mxu0 }
 0x1f5   : > { %v1283_v59 = vadd.f32 %v1912_v58, %v1785_v15  ;;  %v1274_v60 = vpop.f32.mrb[13].mxu0 }
 0x1f6   : > { %v1275_v61 = vadd.f32 %v1785_v15, %v1274_v60  ;;  %v1913_v62 = vpop.f32.mrb[14].mxu0 }
 0x1f7   : > { %v1286_v63 = vadd.f32 %v1913_v62, %v1785_v15  ;;  %v1277_v0 = vpop.f32.mrb[15].mxu0  ;;  %v1303_v2 = vmax.f32 %v1283_v59, 0.0 }
 0x1f8   : > { %v1278_v1 = vadd.f32 %v1785_v15, %v1277_v0  ;;  %v1301_v4 = vmax.f32 %v1275_v61, 0.0 }
 0x1f9   : > { %v1304_v3 = vmax.f32 %v1286_v63, 0.0 }
 0x1fa   : > { %v1302_v5 = vmax.f32 %v1278_v1, 0.0 }
 0x1fb   : > { %v1312_v6 = vpack.c.bf16 %v1304_v3, %v1303_v2 }
 0x1fc   : > { %v1311_v7 = vpack.c.bf16 %v1302_v5, %v1301_v4 }
 0x1fe   : > { %1934 = vmatprep.mubr.msk.bf16.mxu1 %vm1352_vm12, %v1311_v7 }
 0x1ff   : > { %1935 = vmatmul.mubr.msk.bf16.gmra.mrb[12].mxu1 %vm1352_vm12, %v1312_v6 }
 0x276   : > { %v1924_v9 = vpop.f32.mrb[0].mxu1 }
 0x277   : > { %v1411_v10 = vpop.f32.mrb[1].mxu1  ;;  %v1420_v15 = vadd.f32 %v1924_v9, %v1797_v8 }
 0x278   : > { %v1412_v11 = vadd.f32 %v1797_v8, %v1411_v10  ;;  %v1925_v12 = vpop.f32.mrb[2].mxu1 }
 0x279   : > { %v1414_v13 = vpop.f32.mrb[3].mxu1  ;;  %v1423_v16 = vadd.f32 %v1925_v12, %v1797_v8 }
 0x27a   : > { %1474 = vxpose.xlu0.b32.start [1/16] (narrow) %v1412_v11, 64  ;;  %v1415_v14 = vadd.f32 %v1797_v8, %v1414_v13 }
 0x27e   : > { %1475 = vxpose.xlu0.b32.cont [2/16] (narrow) %v1415_v14, 64 }
 0x282   : > { %1476 = vxpose.xlu0.b32.cont [3/16] (narrow) %v1420_v15, 64 }
 0x286   : > { %1477 = vxpose.xlu0.b32.cont [4/16] (narrow) %v1423_v16, 64 }
 0x295   : > { %v1928_v17 = vpop.f32.mrb[4].mxu1 }
 0x296   : > { %v1427_v18 = vpop.f32.mrb[5].mxu1  ;;  %v1436_v23 = vadd.f32 %v1928_v17, %v1797_v8 }
 0x297   : > { %v1428_v19 = vadd.f32 %v1797_v8, %v1427_v18  ;;  %v1929_v20 = vpop.f32.mrb[6].mxu1 }
 0x298   : > { %v1430_v21 = vpop.f32.mrb[7].mxu1  ;;  %v1439_v24 = vadd.f32 %v1929_v20, %v1797_v8 }
 0x299   : > { %1478 = vxpose.xlu0.b32.cont [5/16] (narrow) %v1428_v19, 64  ;;  %v1431_v22 = vadd.f32 %v1797_v8, %v1430_v21 }
 0x29d   : > { %1479 = vxpose.xlu0.b32.cont [6/16] (narrow) %v1431_v22, 64 }
 0x2a1   : > { %1480 = vxpose.xlu0.b32.cont [7/16] (narrow) %v1436_v23, 64 }
 0x2a5   : > { %1481 = vxpose.xlu0.b32.cont [8/16] (narrow) %v1439_v24, 64 }
 0x2b5   : > { %v1932_v25 = vpop.f32.mrb[8].mxu1 }
 0x2b6   : > { %v1443_v26 = vpop.f32.mrb[9].mxu1  ;;  %v1452_v31 = vadd.f32 %v1932_v25, %v1797_v8 }
 0x2b7   : > { %v1444_v27 = vadd.f32 %v1797_v8, %v1443_v26  ;;  %v1933_v28 = vpop.f32.mrb[10].mxu1 }
 0x2b8   : > { %v1446_v29 = vpop.f32.mrb[11].mxu1  ;;  %v1455_v32 = vadd.f32 %v1933_v28, %v1797_v8 }
 0x2b9   : > { %1482 = vxpose.xlu0.b32.cont [9/16] (narrow) %v1444_v27, 64  ;;  %v1447_v30 = vadd.f32 %v1797_v8, %v1446_v29 }
 0x2bd   : > { %1483 = vxpose.xlu0.b32.cont [10/16] (narrow) %v1447_v30, 64 }
 0x2c1   : > { %1484 = vxpose.xlu0.b32.cont [11/16] (narrow) %v1452_v31, 64 }
 0x2c5   : > { %1485 = vxpose.xlu0.b32.cont [12/16] (narrow) %v1455_v32, 64 }
 0x2d2   : > { %v1936_v33 = vpop.f32.mrb[12].mxu1 }
 0x2d3   : > { %v1459_v34 = vpop.f32.mrb[13].mxu1  ;;  %v1468_v39 = vadd.f32 %v1936_v33, %v1797_v8 }
 0x2d4   : > { %v1460_v35 = vadd.f32 %v1797_v8, %v1459_v34  ;;  %v1937_v36 = vpop.f32.mrb[14].mxu1 }
 0x2d5   : > { %v1462_v37 = vpop.f32.mrb[15].mxu1  ;;  %v1471_v40 = vadd.f32 %v1937_v36, %v1797_v8 }
 0x2d6   : > { %1486 = vxpose.xlu0.b32.cont [13/16] (narrow) %v1460_v35, 64  ;;  %v1463_v38 = vadd.f32 %v1797_v8, %v1462_v37 }
 0x2da   : > { %1487 = vxpose.xlu0.b32.cont [14/16] (narrow) %v1463_v38, 64 }
 0x2de   : > { %1488 = vxpose.xlu0.b32.cont [15/16] (narrow) %v1468_v39, 64 }
 0x2e2   : > { %1489 = vxpose.xlu0.b32.end [16/16] (narrow) %v1471_v40, 64 }
 0x326   : > { %v1490_v41 = vpop.trf.xlu0 }
 0x327   : > { %v1810_v42 = vmul.f32 -1.442695, %v1490_v41 }
 0x329   : > { %2013 = vpow2.f32 %v1810_v42 }
 0x32a   : > { %v1491_v43 = vpop.trf.xlu0 }
 0x32b   : > { %1515 = vst [vmem:[%s2497_s24] sm:$0xff] %v1491_v43 }
 0x32e   : > { %v1492_v44 = vpop.trf.xlu0 }
 0x32f   : > { %1516 = vst [vmem:[%s2497_s24 + $0x8] sm:$0xff] %v1492_v44 }
 0x332   : > { %v1493_v45 = vpop.trf.xlu0  ;;  %v1583_v55 = vld [vmem:[%s2497_s24] sm:$0xff] (%p2173_p5) }
 0x333   : > { %v2014_v46 = vpop.eup %2013  ;;  %1517 = vst [vmem:[%s2497_s24 + $0x10] sm:$0xff] %v1493_v45  ;;  %1584 = vst [vmem:[%s1543_s27] sm:$0xff] (%p2173_p5), %v1583_v55 }
 0x334   : > { %v1509_v47 = vadd.f32 1.0, %v2014_v46 }
 0x336   : > { %2015 = vrcp.f32 %v1509_v47  ;;  %v1494_v48 = vpop.trf.xlu0  ;;  %v1585_v56 = vld [vmem:[%s2497_s24 + $0x8] sm:$0xff] (%p2173_p5) }
 0x337   : > { %1518 = vst [vmem:[%s2497_s24 + $0x18] sm:$0xff] %v1494_v48  ;;  %1586 = vst [vmem:[%s1543_s27 + $0x10] sm:$0xff] (%p2173_p5), %v1585_v56 }
 0x33a   : > { %v1495_v49 = vpop.trf.xlu0  ;;  %v1587_v57 = vld [vmem:[%s2497_s24 + $0x10] sm:$0xff] (%p2173_p5) }
 0x33b   : > { %1519 = vst [vmem:[%s2497_s24 + $0x20] sm:$0xff] %v1495_v49  ;;  %1588 = vst [vmem:[%s1543_s27 + $0x20] sm:$0xff] (%p2173_p5), %v1587_v57 }
 0x33e   : > { %v1496_v50 = vpop.trf.xlu0  ;;  %v1589_v58 = vld [vmem:[%s2497_s24 + $0x18] sm:$0xff] (%p2173_p5) }
 0x33f   : > { %1520 = vst [vmem:[%s2497_s24 + $0x28] sm:$0xff] %v1496_v50  ;;  %1539 = sbr.rel (!%p2173_p5) target bundleno = 844 (0x34c), region = 56  ;;  %1590 = vst [vmem:[%s1543_s27 + $0x30] sm:$0xff] (%p2173_p5), %v1589_v58 }
 0x340   : > { %v2016_v51 = vpop.eup %2015 }
 0x341   : > { %v1512_v52 = vmax.f32 %v2016_v51, 0.0001 }
 0x342   : > { %v1497_v53 = vpop.trf.xlu0  ;;  %v1591_v59 = vld [vmem:[%s2497_s24 + $0x20] sm:$0xff] (%p2173_p5) }
 0x343   : > { %v1513_v54 = vmin.f32 %v1512_v52, 0.9999  ;;  %1521 = vst [vmem:[%s2497_s24 + $0x30] sm:$0x3] %v1497_v53  ;;  %1592 = vst [vmem:[%s1543_s27 + $0x40] sm:$0xff] (%p2173_p5), %v1591_v59 }
 0x345   : > { %1514 = vst [vmem:[%s477_s17] sm:$0x7] %v1513_v54 }
 0x346   : > { %v1593_v60 = vld [vmem:[%s2497_s24 + $0x28] sm:$0xff] }
 0x347   : > { %1594 = vst [vmem:[%s1543_s27 + $0x50] sm:$0xff] %v1593_v60 }
 0x34a   : > { %v1595_v61 = vld [vmem:[%s2497_s24 + $0x30] sm:$0xff] }
 0x34b   : > { %1596 = vst [vmem:[%s1543_s27 + $0x60] sm:$0xff] %v1595_v61 }
 0x34c PF: > { %s19_s11 = sadd.s32 1, %s2071_s11   ;;  %s2565_s27 = smov %s2051_s28 }
 0x34d   : > { %p16_p2 = scmp.ge.s32.totalorder %s19_s11, 6   ;;  %s2566_s28 = smov %s2184_s20 }
 0x34e   : > { %s2567_s29 = smov %s2063_s9  ;;  %s2568_s30 = smov %s2067_s10 }
 0x34f   : > { %s2569_s9 = smov %s2572_s12  ;;  %s2570_s10 = smov %s2576_s13 }
 0x350   :  { %18 = sbr.rel (!%p16_p2) target bundleno = 4 (0x4), region = 137 }

</bundles_post_ra>
